<compile_context>
chip_gen: v5e
topology: v5e:2x2
jax: 0.10.0
libtpu: 0.0.40
codegen_flags: <defaults>
</compile_context>

<pallas_src>
import functools

import jax
import jax.numpy as jnp
from jax import lax
from jax.experimental import pallas as pl
from jax.experimental.pallas import tpu as pltpu

_VMEM_LIMIT = 32 * 1024 * 1024     # safe on v5e/v6e/v7x; re-derive for big configs
_TILE_M_CAP = 256                  # rows per activation tile


def _tile_m(m, cap=_TILE_M_CAP):
    """Largest tile <= cap that evenly divides m (full extent if m is small)."""
    if m <= cap:
        return m
    t = cap
    while t >= 8:
        if m % t == 0:
            return t
        t //= 2
    return m


def _cparams(num_parallel_axes):
    return pltpu.CompilerParams(
        dimension_semantics=("parallel",) * num_parallel_axes,
        vmem_limit_bytes=_VMEM_LIMIT,
    )


# ----------------------------------------------------------------------------
# Pallas kernels
# ----------------------------------------------------------------------------
def _ln_matmul_kernel(x_ref, g_ref, b_ref, w_ref, bias_ref, o_ref):
    """out = LayerNorm(x) @ W + bias   (LN stats f32, matmul bf16 -> f32 acc)."""
    x = x_ref[...].astype(jnp.float32)
    mu = jnp.mean(x, axis=-1, keepdims=True)
    xc = x - mu
    var = jnp.mean(xc * xc, axis=-1, keepdims=True)
    ln = xc * lax.rsqrt(var + 1e-5) * g_ref[...] + b_ref[...]
    acc = jnp.dot(ln.astype(jnp.bfloat16), w_ref[...],
                  preferred_element_type=jnp.float32)
    o_ref[...] = (acc + bias_ref[...]).astype(o_ref.dtype)


def ln_matmul(x, g, b, w, bias):
    M, D = x.shape
    N = w.shape[1]
    tm = _tile_m(M)
    return pl.pallas_call(
        _ln_matmul_kernel,
        out_shape=jax.ShapeDtypeStruct((M, N), jnp.float32),
        grid=(M // tm,),
        in_specs=[
            pl.BlockSpec((tm, D), lambda i: (i, 0)),
            pl.BlockSpec((1, D), lambda i: (0, 0)),
            pl.BlockSpec((1, D), lambda i: (0, 0)),
            pl.BlockSpec((D, N), lambda i: (0, 0)),
            pl.BlockSpec((1, N), lambda i: (0, 0)),
        ],
        out_specs=pl.BlockSpec((tm, N), lambda i: (i, 0)),
        compiler_params=_cparams(1),
    )(x, g.reshape(1, D), b.reshape(1, D), w, bias.reshape(1, N))


def _proj_residual_kernel(a_ref, w_ref, b_ref, res_ref, o_ref):
    """out = residual + a @ W + bias."""
    acc = jnp.dot(a_ref[...].astype(jnp.bfloat16), w_ref[...],
                  preferred_element_type=jnp.float32)
    o_ref[...] = (res_ref[...] + acc + b_ref[...]).astype(o_ref.dtype)


def proj_residual(a, w, bias, residual):
    M, D = a.shape
    N = w.shape[1]
    tm = _tile_m(M)
    return pl.pallas_call(
        _proj_residual_kernel,
        out_shape=jax.ShapeDtypeStruct((M, N), jnp.float32),
        grid=(M // tm,),
        in_specs=[
            pl.BlockSpec((tm, D), lambda i: (i, 0)),
            pl.BlockSpec((D, N), lambda i: (0, 0)),
            pl.BlockSpec((1, N), lambda i: (0, 0)),
            pl.BlockSpec((tm, N), lambda i: (i, 0)),
        ],
        out_specs=pl.BlockSpec((tm, N), lambda i: (i, 0)),
        compiler_params=_cparams(1),
    )(a, w, bias.reshape(1, N), residual)


def _ln_mlp_residual_kernel(x_ref, g_ref, b_ref, w1_ref, b1_ref, w2_ref, b2_ref,
                            o_ref):
    """out = x + fc2(quick_gelu(fc1(LayerNorm(x))))."""
    x = x_ref[...].astype(jnp.float32)
    mu = jnp.mean(x, axis=-1, keepdims=True)
    xc = x - mu
    var = jnp.mean(xc * xc, axis=-1, keepdims=True)
    ln = xc * lax.rsqrt(var + 1e-5) * g_ref[...] + b_ref[...]
    h = jnp.dot(ln.astype(jnp.bfloat16), w1_ref[...],
                preferred_element_type=jnp.float32) + b1_ref[...]
    h = h * jax.nn.sigmoid(1.702 * h)                          # quick_gelu
    y = jnp.dot(h.astype(jnp.bfloat16), w2_ref[...],
                preferred_element_type=jnp.float32) + b2_ref[...]
    o_ref[...] = (x + y).astype(o_ref.dtype)


def ln_mlp_residual(x, g, b, w1, b1, w2, b2):
    M, D = x.shape
    F = w1.shape[1]
    tm = _tile_m(M)
    return pl.pallas_call(
        _ln_mlp_residual_kernel,
        out_shape=jax.ShapeDtypeStruct((M, D), jnp.float32),
        grid=(M // tm,),
        in_specs=[
            pl.BlockSpec((tm, D), lambda i: (i, 0)),
            pl.BlockSpec((1, D), lambda i: (0, 0)),
            pl.BlockSpec((1, D), lambda i: (0, 0)),
            pl.BlockSpec((D, F), lambda i: (0, 0)),
            pl.BlockSpec((1, F), lambda i: (0, 0)),
            pl.BlockSpec((F, D), lambda i: (0, 0)),
            pl.BlockSpec((1, D), lambda i: (0, 0)),
        ],
        out_specs=pl.BlockSpec((tm, D), lambda i: (i, 0)),
        compiler_params=_cparams(1),
    )(x, g.reshape(1, D), b.reshape(1, D), w1, b1.reshape(1, F),
      w2, b2.reshape(1, D))


def _layernorm_kernel(x_ref, g_ref, b_ref, o_ref):
    x = x_ref[...].astype(jnp.float32)
    mu = jnp.mean(x, axis=-1, keepdims=True)
    xc = x - mu
    var = jnp.mean(xc * xc, axis=-1, keepdims=True)
    o_ref[...] = (xc * lax.rsqrt(var + 1e-5) * g_ref[...] + b_ref[...]).astype(
        o_ref.dtype)


def layernorm(x, g, b):
    M, D = x.shape
    tm = _tile_m(M)
    return pl.pallas_call(
        _layernorm_kernel,
        out_shape=jax.ShapeDtypeStruct((M, D), jnp.float32),
        grid=(M // tm,),
        in_specs=[
            pl.BlockSpec((tm, D), lambda i: (i, 0)),
            pl.BlockSpec((1, D), lambda i: (0, 0)),
            pl.BlockSpec((1, D), lambda i: (0, 0)),
        ],
        out_specs=pl.BlockSpec((tm, D), lambda i: (i, 0)),
        compiler_params=_cparams(1),
    )(x, g.reshape(1, D), b.reshape(1, D))


def _attention_kernel(qkv_ref, mask_ref, o_ref, *, H, Dh):
    """Multi-head causal attention for one batch element.

    qkv_ref : [1, S, 3*D] packed (Q | K | V) activations (f32).
    mask_ref: [S, S] additive causal bias (0 / -1e9), hoisted out of the grid.
    o_ref   : [1, S, D] -> single lane-dense store covering all heads.
    """
    D = H * Dh
    scale = jnp.float32(1.0 / (Dh ** 0.5))
    qkv = qkv_ref[0].astype(jnp.bfloat16)            # one lane-dense load
    mask = mask_ref[...]                             # [S, S] f32
    outs = []
    for h in range(H):                               # static unroll over heads
        q = qkv[:, h * Dh:(h + 1) * Dh]
        k = qkv[:, D + h * Dh:D + (h + 1) * Dh]
        v = qkv[:, 2 * D + h * Dh:2 * D + (h + 1) * Dh]
        # contract last dims directly -- no k.T materialization
        s = lax.dot_general(q, k, (((1,), (1,)), ((), ())),
                            preferred_element_type=jnp.float32)
        s = s * scale + mask                         # scores stay in f32
        s = s - jnp.max(s, axis=-1, keepdims=True)
        p = jnp.exp(s)
        denom = jnp.sum(p, axis=-1, keepdims=True)
        p = p * pl.reciprocal(denom, approx=True)    # EUP, essentially free
        outs.append(jnp.dot(p.astype(jnp.bfloat16), v,
                            preferred_element_type=jnp.float32))
    o_ref[0] = jnp.concatenate(outs, axis=-1).astype(o_ref.dtype)


def attention(qkv, mask, num_heads):
    B, S, threeD = qkv.shape
    D = threeD // 3
    Dh = D // num_heads
    kernel = functools.partial(_attention_kernel, H=num_heads, Dh=Dh)
    return pl.pallas_call(
        kernel,
        out_shape=jax.ShapeDtypeStruct((B, S, D), jnp.float32),
        grid=(B,),
        in_specs=[
            pl.BlockSpec((1, S, threeD), lambda b: (b, 0, 0)),
            pl.BlockSpec((S, S), lambda b: (0, 0)),
        ],
        out_specs=pl.BlockSpec((1, S, D), lambda b: (b, 0, 0)),
        compiler_params=_cparams(1),
    )(qkv, mask)


# ----------------------------------------------------------------------------
# CLIP text encoder forward (glue in plain JAX, hot paths in Pallas)
# ----------------------------------------------------------------------------
def clip_text_encoder(params, input_ids, num_heads):
    B, S = input_ids.shape
    D = params["tok_emb"].shape[1]
    M = B * S

    # embeddings (gather is XLA glue)
    h = params["tok_emb"][input_ids] + params["pos_emb"][:S][None, :, :]
    h = h.reshape(M, D)

    # additive causal mask, built once and reused by every layer / grid step
    row = lax.broadcasted_iota(jnp.int32, (S, S), 0)
    col = lax.broadcasted_iota(jnp.int32, (S, S), 1)
    mask = jnp.where(col <= row, 0.0, -1e9).astype(jnp.float32)

    for lp in params["layers"]:
        # fused LN1 + packed QKV projection
        qkv = ln_matmul(h, lp["ln1_g"], lp["ln1_b"], lp["w_qkv"], lp["b_qkv"])
        # fused multi-head causal attention, lane-dense [B, S, D] output
        a = attention(qkv.reshape(B, S, 3 * D), mask, num_heads)
        # fused out-projection + residual add
        h = proj_residual(a.reshape(M, D), lp["wo"], lp["bo"], h)
        # fused LN2 + MLP(quick_gelu) + residual add
        h = ln_mlp_residual(h, lp["ln2_g"], lp["ln2_b"],
                            lp["w1"], lp["b1"], lp["w2"], lp["b2"])

    hf = layernorm(h, params["lnf_g"], params["lnf_b"]).reshape(B, S, D)

    # pooled output: hidden state at EOS token (argmax of token id, as in HF CLIP)
    # TODO(synk): argmax-as-EOS matches HF CLIP only when EOS is the max vocab id.
    eos_idx = jnp.argmax(input_ids, axis=-1)
    pooled = hf[jnp.arange(B), eos_idx]                      # [B, D]

    # text_projection (no bias): [B, D] x [D, proj] is tiny -> plain XLA epilogue
    return pooled @ params["w_proj"]


# ----------------------------------------------------------------------------
# Deterministic parameter construction
# ----------------------------------------------------------------------------
def init_params(key, vocab, max_pos, D, F, num_layers, proj_dim):
    ks = iter(jax.random.split(key, 3 + 6 * num_layers))
    std = 0.02

    def w(shape, dtype=jnp.bfloat16):
        return (jax.random.normal(next(ks), shape, jnp.float32) * std).astype(dtype)

    p = {
        "tok_emb": w((vocab, D), jnp.float32),
        "pos_emb": w((max_pos, D), jnp.float32),
        "lnf_g": jnp.ones((D,), jnp.float32),
        "lnf_b": jnp.zeros((D,), jnp.float32),
        "w_proj": w((D, proj_dim), jnp.float32),
        "layers": [],
    }
    for _ in range(num_layers):
        wq, wk, wv = w((D, D)), w((D, D)), w((D, D))
        lp = {
            "ln1_g": jnp.ones((D,), jnp.float32),
            "ln1_b": jnp.zeros((D,), jnp.float32),
            "w_qkv": jnp.concatenate([wq, wk, wv], axis=1),    # [D, 3D] bf16
            "b_qkv": jnp.zeros((3 * D,), jnp.float32),
            "wo": w((D, D)), "bo": jnp.zeros((D,), jnp.float32),
            "ln2_g": jnp.ones((D,), jnp.float32),
            "ln2_b": jnp.zeros((D,), jnp.float32),
            "w1": w((D, F)), "b1": jnp.zeros((F,), jnp.float32),
            "w2": w((F, D)), "b2": jnp.zeros((D,), jnp.float32),
        }
        p["layers"].append(lp)
    return p


if __name__ == "__main__":
    # small CLIP-text-like config
    B, S = 2, 8
    VOCAB, MAX_POS = 64, 16
    D, F, HEADS, LAYERS, PROJ = 32, 64, 4, 2, 32

    key = jax.random.PRNGKey(0)
    k_param, k_tok = jax.random.split(key)
    params = init_params(k_param, VOCAB, MAX_POS, D, F, LAYERS, PROJ)

    # synthetic pre-tokenized input ("text" already run through the tokenizer)
    input_ids = jax.random.randint(k_tok, (B, S), 0, VOCAB - 1, dtype=jnp.int32)
    input_ids = input_ids.at[:, -1].set(VOCAB - 1)   # EOS (max id) at end of seq

    fwd = jax.jit(functools.partial(clip_text_encoder, num_heads=HEADS))
    text_embeds = fwd(params, input_ids)
    jax.block_until_ready(text_embeds)
    assert text_embeds.shape == (B, PROJ)
    print("KERNEL_OK")
</pallas_src>

<mosaic_0001>
module attributes {stable_mosaic.version = 11 : i64} {
  func.func @_ln_mlp_residual_kernel(%arg0: i32, %arg1: memref<16x32xf32, #tpu.memory_space<vmem>>, %arg2: memref<1x32xf32, #tpu.memory_space<vmem>>, %arg3: memref<1x32xf32, #tpu.memory_space<vmem>>, %arg4: memref<32x64xbf16, #tpu.memory_space<vmem>>, %arg5: memref<1x64xf32, #tpu.memory_space<vmem>>, %arg6: memref<64x32xbf16, #tpu.memory_space<vmem>>, %arg7: memref<1x32xf32, #tpu.memory_space<vmem>>, %arg8: memref<16x32xf32, #tpu.memory_space<vmem>>) attributes {dimension_semantics = [#tpu.dimension_semantics<parallel>], iteration_bounds = array<i64: 1>, scalar_prefetch = 0 : i64, scratch_operands = 0 : i64, tpu.core_type = #tpu.core_type<tc>, window_params = [{transform_indices = @transform_0, window_bounds = array<i64: 16, 32>}, {pipeline_mode = #tpu.pipeline_mode<synchronous>, transform_indices = @transform_1, window_bounds = array<i64: 1, 32>}, {pipeline_mode = #tpu.pipeline_mode<synchronous>, transform_indices = @transform_2, window_bounds = array<i64: 1, 32>}, {pipeline_mode = #tpu.pipeline_mode<synchronous>, transform_indices = @transform_3, window_bounds = array<i64: 32, 64>}, {pipeline_mode = #tpu.pipeline_mode<synchronous>, transform_indices = @transform_4, window_bounds = array<i64: 1, 64>}, {pipeline_mode = #tpu.pipeline_mode<synchronous>, transform_indices = @transform_5, window_bounds = array<i64: 64, 32>}, {pipeline_mode = #tpu.pipeline_mode<synchronous>, transform_indices = @transform_6, window_bounds = array<i64: 1, 32>}, {transform_indices = @transform_7, window_bounds = array<i64: 16, 32>}]} {
    %c0 = arith.constant 0 : index
    %c0_0 = arith.constant 0 : index
    %0 = vector.load %arg1[%c0, %c0_0] : memref<16x32xf32, #tpu.memory_space<vmem>>, vector<16x32xf32>
    %cst = arith.constant dense<0.000000e+00> : vector<16xf32>
    %1 = vector.multi_reduction <add>, %0, %cst [1] : vector<16x32xf32> to vector<16xf32>
    %2 = vector.shape_cast %1 : vector<16xf32> to vector<16x1xf32>
    %cst_1 = arith.constant 3.200000e+01 : f32
    %3 = vector.broadcast %cst_1 : f32 to vector<16x1xf32>
    %4 = arith.divf %2, %3 : vector<16x1xf32>
    %5 = vector.broadcast %4 : vector<16x1xf32> to vector<16x32xf32>
    %6 = arith.subf %0, %5 : vector<16x32xf32>
    %7 = arith.mulf %6, %6 : vector<16x32xf32>
    %cst_2 = arith.constant dense<0.000000e+00> : vector<16xf32>
    %8 = vector.multi_reduction <add>, %7, %cst_2 [1] : vector<16x32xf32> to vector<16xf32>
    %9 = vector.shape_cast %8 : vector<16xf32> to vector<16x1xf32>
    %cst_3 = arith.constant 3.200000e+01 : f32
    %10 = vector.broadcast %cst_3 : f32 to vector<16x1xf32>
    %11 = arith.divf %9, %10 : vector<16x1xf32>
    %cst_4 = arith.constant 9.99999974E-6 : f32
    %12 = vector.broadcast %cst_4 : f32 to vector<16x1xf32>
    %13 = arith.addf %11, %12 : vector<16x1xf32>
    %14 = math.rsqrt %13 : vector<16x1xf32>
    %15 = vector.broadcast %14 : vector<16x1xf32> to vector<16x32xf32>
    %16 = arith.mulf %6, %15 : vector<16x32xf32>
    %c0_5 = arith.constant 0 : index
    %c0_6 = arith.constant 0 : index
    %17 = vector.load %arg2[%c0_5, %c0_6] : memref<1x32xf32, #tpu.memory_space<vmem>>, vector<1x32xf32>
    %18 = vector.broadcast %17 : vector<1x32xf32> to vector<16x32xf32>
    %19 = arith.mulf %16, %18 : vector<16x32xf32>
    %c0_7 = arith.constant 0 : index
    %c0_8 = arith.constant 0 : index
    %20 = vector.load %arg3[%c0_7, %c0_8] : memref<1x32xf32, #tpu.memory_space<vmem>>, vector<1x32xf32>
    %21 = vector.broadcast %20 : vector<1x32xf32> to vector<16x32xf32>
    %22 = arith.addf %19, %21 : vector<16x32xf32>
    %23 = arith.truncf %22 : vector<16x32xf32> to vector<16x32xbf16>
    %c0_9 = arith.constant 0 : index
    %c0_10 = arith.constant 0 : index
    %24 = vector.load %arg4[%c0_9, %c0_10] : memref<32x64xbf16, #tpu.memory_space<vmem>>, vector<32x64xbf16>
    %cst_11 = arith.constant dense<0.000000e+00> : vector<16x64xf32>
    %25 = tpu.matmul %23, %24, %cst_11 {dimension_numbers = #tpu.dot_dimension_numbers<[1], [0], [0], [1], [0, 0, 1, 1], [], []>} : vector<16x32xbf16>, vector<32x64xbf16>, vector<16x64xf32> -> vector<16x64xf32>
    %c0_12 = arith.constant 0 : index
    %c0_13 = arith.constant 0 : index
    %26 = vector.load %arg5[%c0_12, %c0_13] : memref<1x64xf32, #tpu.memory_space<vmem>>, vector<1x64xf32>
    %27 = vector.broadcast %26 : vector<1x64xf32> to vector<16x64xf32>
    %28 = arith.addf %25, %27 : vector<16x64xf32>
    %cst_14 = arith.constant 1.702000e+00 : f32
    %29 = vector.broadcast %cst_14 : f32 to vector<16x64xf32>
    %30 = arith.mulf %29, %28 : vector<16x64xf32>
    %31 = arith.negf %30 : vector<16x64xf32>
    %32 = math.exp %31 : vector<16x64xf32>
    %cst_15 = arith.constant 1.000000e+00 : f32
    %33 = vector.broadcast %cst_15 : f32 to vector<16x64xf32>
    %34 = arith.addf %33, %32 : vector<16x64xf32>
    %35 = arith.divf %33, %34 : vector<16x64xf32>
    %36 = arith.mulf %28, %35 : vector<16x64xf32>
    %37 = arith.truncf %36 : vector<16x64xf32> to vector<16x64xbf16>
    %c0_16 = arith.constant 0 : index
    %c0_17 = arith.constant 0 : index
    %38 = vector.load %arg6[%c0_16, %c0_17] : memref<64x32xbf16, #tpu.memory_space<vmem>>, vector<64x32xbf16>
    %cst_18 = arith.constant dense<0.000000e+00> : vector<16x32xf32>
    %39 = tpu.matmul %37, %38, %cst_18 {dimension_numbers = #tpu.dot_dimension_numbers<[1], [0], [0], [1], [0, 0, 1, 1], [], []>} : vector<16x64xbf16>, vector<64x32xbf16>, vector<16x32xf32> -> vector<16x32xf32>
    %c0_19 = arith.constant 0 : index
    %c0_20 = arith.constant 0 : index
    %40 = vector.load %arg7[%c0_19, %c0_20] : memref<1x32xf32, #tpu.memory_space<vmem>>, vector<1x32xf32>
    %41 = vector.broadcast %40 : vector<1x32xf32> to vector<16x32xf32>
    %42 = arith.addf %39, %41 : vector<16x32xf32>
    %43 = arith.addf %0, %42 : vector<16x32xf32>
    %c0_21 = arith.constant 0 : index
    %c0_22 = arith.constant 0 : index
    %44 = vector.load %arg8[%c0_21, %c0_22] : memref<16x32xf32, #tpu.memory_space<vmem>>, vector<16x32xf32>
    tpu.vector_store %arg8[%c0_21, %c0_22], %43 {strides = array<i32>} : memref<16x32xf32, #tpu.memory_space<vmem>>, vector<16x32xf32>,
    return
  }
  func.func @transform_0(%arg0: i32) -> (i32, i32) {
    %c0_i32 = arith.constant 0 : i32
    %c0_i32_0 = arith.constant 0 : i32
    return %arg0, %c0_i32 : i32, i32
  }
  func.func @transform_1(%arg0: i32) -> (i32, i32) {
    %c0_i32 = arith.constant 0 : i32
    %c0_i32_0 = arith.constant 0 : i32
    %c0_i32_1 = arith.constant 0 : i32
    return %c0_i32, %c0_i32_0 : i32, i32
  }
  func.func @transform_2(%arg0: i32) -> (i32, i32) {
    %c0_i32 = arith.constant 0 : i32
    %c0_i32_0 = arith.constant 0 : i32
    %c0_i32_1 = arith.constant 0 : i32
    return %c0_i32, %c0_i32_0 : i32, i32
  }
  func.func @transform_3(%arg0: i32) -> (i32, i32) {
    %c0_i32 = arith.constant 0 : i32
    %c0_i32_0 = arith.constant 0 : i32
    %c0_i32_1 = arith.constant 0 : i32
    return %c0_i32, %c0_i32_0 : i32, i32
  }
  func.func @transform_4(%arg0: i32) -> (i32, i32) {
    %c0_i32 = arith.constant 0 : i32
    %c0_i32_0 = arith.constant 0 : i32
    %c0_i32_1 = arith.constant 0 : i32
    return %c0_i32, %c0_i32_0 : i32, i32
  }
  func.func @transform_5(%arg0: i32) -> (i32, i32) {
    %c0_i32 = arith.constant 0 : i32
    %c0_i32_0 = arith.constant 0 : i32
    %c0_i32_1 = arith.constant 0 : i32
    return %c0_i32, %c0_i32_0 : i32, i32
  }
  func.func @transform_6(%arg0: i32) -> (i32, i32) {
    %c0_i32 = arith.constant 0 : i32
    %c0_i32_0 = arith.constant 0 : i32
    %c0_i32_1 = arith.constant 0 : i32
    return %c0_i32, %c0_i32_0 : i32, i32
  }
  func.func @transform_7(%arg0: i32) -> (i32, i32) {
    %c0_i32 = arith.constant 0 : i32
    %c0_i32_0 = arith.constant 0 : i32
    return %arg0, %c0_i32 : i32, i32
  }
}

module attributes {stable_mosaic.version = 11 : i64} {
  func.func @_ln_matmul_kernel(%arg0: i32, %arg1: memref<16x32xf32, #tpu.memory_space<vmem>>, %arg2: memref<1x32xf32, #tpu.memory_space<vmem>>, %arg3: memref<1x32xf32, #tpu.memory_space<vmem>>, %arg4: memref<32x96xbf16, #tpu.memory_space<vmem>>, %arg5: memref<1x96xf32, #tpu.memory_space<vmem>>, %arg6: memref<16x96xf32, #tpu.memory_space<vmem>>) attributes {dimension_semantics = [#tpu.dimension_semantics<parallel>], iteration_bounds = array<i64: 1>, scalar_prefetch = 0 : i64, scratch_operands = 0 : i64, tpu.core_type = #tpu.core_type<tc>, window_params = [{transform_indices = @transform_0, window_bounds = array<i64: 16, 32>}, {pipeline_mode = #tpu.pipeline_mode<synchronous>, transform_indices = @transform_1, window_bounds = array<i64: 1, 32>}, {pipeline_mode = #tpu.pipeline_mode<synchronous>, transform_indices = @transform_2, window_bounds = array<i64: 1, 32>}, {pipeline_mode = #tpu.pipeline_mode<synchronous>, transform_indices = @transform_3, window_bounds = array<i64: 32, 96>}, {pipeline_mode = #tpu.pipeline_mode<synchronous>, transform_indices = @transform_4, window_bounds = array<i64: 1, 96>}, {transform_indices = @transform_5, window_bounds = array<i64: 16, 96>}]} {
    %c0 = arith.constant 0 : index
    %c0_0 = arith.constant 0 : index
    %0 = vector.load %arg1[%c0, %c0_0] : memref<16x32xf32, #tpu.memory_space<vmem>>, vector<16x32xf32>
    %cst = arith.constant dense<0.000000e+00> : vector<16xf32>
    %1 = vector.multi_reduction <add>, %0, %cst [1] : vector<16x32xf32> to vector<16xf32>
    %2 = vector.shape_cast %1 : vector<16xf32> to vector<16x1xf32>
    %cst_1 = arith.constant 3.200000e+01 : f32
    %3 = vector.broadcast %cst_1 : f32 to vector<16x1xf32>
    %4 = arith.divf %2, %3 : vector<16x1xf32>
    %5 = vector.broadcast %4 : vector<16x1xf32> to vector<16x32xf32>
    %6 = arith.subf %0, %5 : vector<16x32xf32>
    %7 = arith.mulf %6, %6 : vector<16x32xf32>
    %cst_2 = arith.constant dense<0.000000e+00> : vector<16xf32>
    %8 = vector.multi_reduction <add>, %7, %cst_2 [1] : vector<16x32xf32> to vector<16xf32>
    %9 = vector.shape_cast %8 : vector<16xf32> to vector<16x1xf32>
    %cst_3 = arith.constant 3.200000e+01 : f32
    %10 = vector.broadcast %cst_3 : f32 to vector<16x1xf32>
    %11 = arith.divf %9, %10 : vector<16x1xf32>
    %cst_4 = arith.constant 9.99999974E-6 : f32
    %12 = vector.broadcast %cst_4 : f32 to vector<16x1xf32>
    %13 = arith.addf %11, %12 : vector<16x1xf32>
    %14 = math.rsqrt %13 : vector<16x1xf32>
    %15 = vector.broadcast %14 : vector<16x1xf32> to vector<16x32xf32>
    %16 = arith.mulf %6, %15 : vector<16x32xf32>
    %c0_5 = arith.constant 0 : index
    %c0_6 = arith.constant 0 : index
    %17 = vector.load %arg2[%c0_5, %c0_6] : memref<1x32xf32, #tpu.memory_space<vmem>>, vector<1x32xf32>
    %18 = vector.broadcast %17 : vector<1x32xf32> to vector<16x32xf32>
    %19 = arith.mulf %16, %18 : vector<16x32xf32>
    %c0_7 = arith.constant 0 : index
    %c0_8 = arith.constant 0 : index
    %20 = vector.load %arg3[%c0_7, %c0_8] : memref<1x32xf32, #tpu.memory_space<vmem>>, vector<1x32xf32>
    %21 = vector.broadcast %20 : vector<1x32xf32> to vector<16x32xf32>
    %22 = arith.addf %19, %21 : vector<16x32xf32>
    %23 = arith.truncf %22 : vector<16x32xf32> to vector<16x32xbf16>
    %c0_9 = arith.constant 0 : index
    %c0_10 = arith.constant 0 : index
    %24 = vector.load %arg4[%c0_9, %c0_10] : memref<32x96xbf16, #tpu.memory_space<vmem>>, vector<32x96xbf16>
    %cst_11 = arith.constant dense<0.000000e+00> : vector<16x96xf32>
    %25 = tpu.matmul %23, %24, %cst_11 {dimension_numbers = #tpu.dot_dimension_numbers<[1], [0], [0], [1], [0, 0, 1, 1], [], []>} : vector<16x32xbf16>, vector<32x96xbf16>, vector<16x96xf32> -> vector<16x96xf32>
    %c0_12 = arith.constant 0 : index
    %c0_13 = arith.constant 0 : index
    %26 = vector.load %arg5[%c0_12, %c0_13] : memref<1x96xf32, #tpu.memory_space<vmem>>, vector<1x96xf32>
    %27 = vector.broadcast %26 : vector<1x96xf32> to vector<16x96xf32>
    %28 = arith.addf %25, %27 : vector<16x96xf32>
    %c0_14 = arith.constant 0 : index
    %c0_15 = arith.constant 0 : index
    %29 = vector.load %arg6[%c0_14, %c0_15] : memref<16x96xf32, #tpu.memory_space<vmem>>, vector<16x96xf32>
    tpu.vector_store %arg6[%c0_14, %c0_15], %28 {strides = array<i32>} : memref<16x96xf32, #tpu.memory_space<vmem>>, vector<16x96xf32>,
    return
  }
  func.func @transform_0(%arg0: i32) -> (i32, i32) {
    %c0_i32 = arith.constant 0 : i32
    %c0_i32_0 = arith.constant 0 : i32
    return %arg0, %c0_i32 : i32, i32
  }
  func.func @transform_1(%arg0: i32) -> (i32, i32) {
    %c0_i32 = arith.constant 0 : i32
    %c0_i32_0 = arith.constant 0 : i32
    %c0_i32_1 = arith.constant 0 : i32
    return %c0_i32, %c0_i32_0 : i32, i32
  }
  func.func @transform_2(%arg0: i32) -> (i32, i32) {
    %c0_i32 = arith.constant 0 : i32
    %c0_i32_0 = arith.constant 0 : i32
    %c0_i32_1 = arith.constant 0 : i32
    return %c0_i32, %c0_i32_0 : i32, i32
  }
  func.func @transform_3(%arg0: i32) -> (i32, i32) {
    %c0_i32 = arith.constant 0 : i32
    %c0_i32_0 = arith.constant 0 : i32
    %c0_i32_1 = arith.constant 0 : i32
    return %c0_i32, %c0_i32_0 : i32, i32
  }
  func.func @transform_4(%arg0: i32) -> (i32, i32) {
    %c0_i32 = arith.constant 0 : i32
    %c0_i32_0 = arith.constant 0 : i32
    %c0_i32_1 = arith.constant 0 : i32
    return %c0_i32, %c0_i32_0 : i32, i32
  }
  func.func @transform_5(%arg0: i32) -> (i32, i32) {
    %c0_i32 = arith.constant 0 : i32
    %c0_i32_0 = arith.constant 0 : i32
    return %arg0, %c0_i32 : i32, i32
  }
}

module attributes {stable_mosaic.version = 11 : i64} {
  func.func @_proj_residual_kernel(%arg0: i32, %arg1: memref<16x32xf32, #tpu.memory_space<vmem>>, %arg2: memref<32x32xbf16, #tpu.memory_space<vmem>>, %arg3: memref<1x32xf32, #tpu.memory_space<vmem>>, %arg4: memref<16x32xf32, #tpu.memory_space<vmem>>, %arg5: memref<16x32xf32, #tpu.memory_space<vmem>>) attributes {dimension_semantics = [#tpu.dimension_semantics<parallel>], iteration_bounds = array<i64: 1>, scalar_prefetch = 0 : i64, scratch_operands = 0 : i64, tpu.core_type = #tpu.core_type<tc>, window_params = [{transform_indices = @transform_0, window_bounds = array<i64: 16, 32>}, {pipeline_mode = #tpu.pipeline_mode<synchronous>, transform_indices = @transform_1, window_bounds = array<i64: 32, 32>}, {pipeline_mode = #tpu.pipeline_mode<synchronous>, transform_indices = @transform_2, window_bounds = array<i64: 1, 32>}, {transform_indices = @transform_3, window_bounds = array<i64: 16, 32>}, {transform_indices = @transform_4, window_bounds = array<i64: 16, 32>}]} {
    %c0 = arith.constant 0 : index
    %c0_0 = arith.constant 0 : index
    %0 = vector.load %arg1[%c0, %c0_0] : memref<16x32xf32, #tpu.memory_space<vmem>>, vector<16x32xf32>
    %1 = arith.truncf %0 : vector<16x32xf32> to vector<16x32xbf16>
    %c0_1 = arith.constant 0 : index
    %c0_2 = arith.constant 0 : index
    %2 = vector.load %arg2[%c0_1, %c0_2] : memref<32x32xbf16, #tpu.memory_space<vmem>>, vector<32x32xbf16>
    %cst = arith.constant dense<0.000000e+00> : vector<16x32xf32>
    %3 = tpu.matmul %1, %2, %cst {dimension_numbers = #tpu.dot_dimension_numbers<[1], [0], [0], [1], [0, 0, 1, 1], [], []>} : vector<16x32xbf16>, vector<32x32xbf16>, vector<16x32xf32> -> vector<16x32xf32>
    %c0_3 = arith.constant 0 : index
    %c0_4 = arith.constant 0 : index
    %4 = vector.load %arg4[%c0_3, %c0_4] : memref<16x32xf32, #tpu.memory_space<vmem>>, vector<16x32xf32>
    %5 = arith.addf %4, %3 : vector<16x32xf32>
    %c0_5 = arith.constant 0 : index
    %c0_6 = arith.constant 0 : index
    %6 = vector.load %arg3[%c0_5, %c0_6] : memref<1x32xf32, #tpu.memory_space<vmem>>, vector<1x32xf32>
    %7 = vector.broadcast %6 : vector<1x32xf32> to vector<16x32xf32>
    %8 = arith.addf %5, %7 : vector<16x32xf32>
    %c0_7 = arith.constant 0 : index
    %c0_8 = arith.constant 0 : index
    %9 = vector.load %arg5[%c0_7, %c0_8] : memref<16x32xf32, #tpu.memory_space<vmem>>, vector<16x32xf32>
    tpu.vector_store %arg5[%c0_7, %c0_8], %8 {strides = array<i32>} : memref<16x32xf32, #tpu.memory_space<vmem>>, vector<16x32xf32>,
    return
  }
  func.func @transform_0(%arg0: i32) -> (i32, i32) {
    %c0_i32 = arith.constant 0 : i32
    %c0_i32_0 = arith.constant 0 : i32
    return %arg0, %c0_i32 : i32, i32
  }
  func.func @transform_1(%arg0: i32) -> (i32, i32) {
    %c0_i32 = arith.constant 0 : i32
    %c0_i32_0 = arith.constant 0 : i32
    %c0_i32_1 = arith.constant 0 : i32
    return %c0_i32, %c0_i32_0 : i32, i32
  }
  func.func @transform_2(%arg0: i32) -> (i32, i32) {
    %c0_i32 = arith.constant 0 : i32
    %c0_i32_0 = arith.constant 0 : i32
    %c0_i32_1 = arith.constant 0 : i32
    return %c0_i32, %c0_i32_0 : i32, i32
  }
  func.func @transform_3(%arg0: i32) -> (i32, i32) {
    %c0_i32 = arith.constant 0 : i32
    %c0_i32_0 = arith.constant 0 : i32
    return %arg0, %c0_i32 : i32, i32
  }
  func.func @transform_4(%arg0: i32) -> (i32, i32) {
    %c0_i32 = arith.constant 0 : i32
    %c0_i32_0 = arith.constant 0 : i32
    return %arg0, %c0_i32 : i32, i32
  }
}

module attributes {stable_mosaic.version = 11 : i64} {
  func.func @_attention_kernel(%arg0: i32, %arg1: memref<1x8x96xf32, #tpu.memory_space<vmem>>, %arg2: memref<8x8xf32, #tpu.memory_space<vmem>>, %arg3: memref<1x8x32xf32, #tpu.memory_space<vmem>>) attributes {dimension_semantics = [#tpu.dimension_semantics<parallel>], iteration_bounds = array<i64: 2>, scalar_prefetch = 0 : i64, scratch_operands = 0 : i64, tpu.core_type = #tpu.core_type<tc>, window_params = [{transform_indices = @transform_0, window_bounds = array<i64: 1, 8, 96>}, {pipeline_mode = #tpu.pipeline_mode<synchronous>, transform_indices = @transform_1, window_bounds = array<i64: 8, 8>}, {transform_indices = @transform_2, window_bounds = array<i64: 1, 8, 32>}]} {
    %c0 = arith.constant 0 : index
    %c0_0 = arith.constant 0 : index
    %c0_1 = arith.constant 0 : index
    %0 = vector.load %arg1[%c0, %c0_0, %c0_1] : memref<1x8x96xf32, #tpu.memory_space<vmem>>, vector<1x8x96xf32>
    %1 = vector.shape_cast %0 : vector<1x8x96xf32> to vector<8x96xf32>
    %2 = arith.truncf %1 : vector<8x96xf32> to vector<8x96xbf16>
    %c0_2 = arith.constant 0 : index
    %c0_3 = arith.constant 0 : index
    %3 = vector.load %arg2[%c0_2, %c0_3] : memref<8x8xf32, #tpu.memory_space<vmem>>, vector<8x8xf32>
    %4 = vector.extract_strided_slice %2 {offsets = [0, 0], sizes = [8, 8], strides = [1, 1]} : vector<8x96xbf16> to vector<8x8xbf16>
    %5 = vector.extract_strided_slice %2 {offsets = [0, 32], sizes = [8, 8], strides = [1, 1]} : vector<8x96xbf16> to vector<8x8xbf16>
    %6 = vector.extract_strided_slice %2 {offsets = [0, 64], sizes = [8, 8], strides = [1, 1]} : vector<8x96xbf16> to vector<8x8xbf16>
    %cst = arith.constant dense<0.000000e+00> : vector<8x8xf32>
    %7 = tpu.matmul %4, %5, %cst {dimension_numbers = #tpu.dot_dimension_numbers<[1], [1], [0], [0], [0, 0, 1, 0], [], []>} : vector<8x8xbf16>, vector<8x8xbf16>, vector<8x8xf32> -> vector<8x8xf32>
    %cst_4 = arith.constant 0.353553385 : f32
    %8 = vector.broadcast %cst_4 : f32 to vector<8x8xf32>
    %9 = arith.mulf %7, %8 : vector<8x8xf32>
    %10 = arith.addf %9, %3 : vector<8x8xf32>
    %cst_5 = arith.constant dense<0xFF800000> : vector<8xf32>
    %11 = vector.multi_reduction <maximumf>, %10, %cst_5 [1] : vector<8x8xf32> to vector<8xf32>
    %12 = vector.shape_cast %11 : vector<8xf32> to vector<8x1xf32>
    %13 = vector.broadcast %12 : vector<8x1xf32> to vector<8x8xf32>
    %14 = arith.subf %10, %13 : vector<8x8xf32>
    %15 = math.exp %14 : vector<8x8xf32>
    %cst_6 = arith.constant dense<0.000000e+00> : vector<8xf32>
    %16 = vector.multi_reduction <add>, %15, %cst_6 [1] : vector<8x8xf32> to vector<8xf32>
    %17 = vector.shape_cast %16 : vector<8xf32> to vector<8x1xf32>
    %18 = tpu.reciprocal %17 {approx = true} : vector<8x1xf32> -> vector<8x1xf32>
    %19 = vector.broadcast %18 : vector<8x1xf32> to vector<8x8xf32>
    %20 = arith.mulf %15, %19 : vector<8x8xf32>
    %21 = arith.truncf %20 : vector<8x8xf32> to vector<8x8xbf16>
    %cst_7 = arith.constant dense<0.000000e+00> : vector<8x8xf32>
    %22 = tpu.matmul %21, %6, %cst_7 {dimension_numbers = #tpu.dot_dimension_numbers<[1], [0], [0], [1], [0, 0, 1, 1], [], []>} : vector<8x8xbf16>, vector<8x8xbf16>, vector<8x8xf32> -> vector<8x8xf32>
    %23 = vector.extract_strided_slice %2 {offsets = [0, 8], sizes = [8, 8], strides = [1, 1]} : vector<8x96xbf16> to vector<8x8xbf16>
    %24 = vector.extract_strided_slice %2 {offsets = [0, 40], sizes = [8, 8], strides = [1, 1]} : vector<8x96xbf16> to vector<8x8xbf16>
    %25 = vector.extract_strided_slice %2 {offsets = [0, 72], sizes = [8, 8], strides = [1, 1]} : vector<8x96xbf16> to vector<8x8xbf16>
    %cst_8 = arith.constant dense<0.000000e+00> : vector<8x8xf32>
    %26 = tpu.matmul %23, %24, %cst_8 {dimension_numbers = #tpu.dot_dimension_numbers<[1], [1], [0], [0], [0, 0, 1, 0], [], []>} : vector<8x8xbf16>, vector<8x8xbf16>, vector<8x8xf32> -> vector<8x8xf32>
    %cst_9 = arith.constant 0.353553385 : f32
    %27 = vector.broadcast %cst_9 : f32 to vector<8x8xf32>
    %28 = arith.mulf %26, %27 : vector<8x8xf32>
    %29 = arith.addf %28, %3 : vector<8x8xf32>
    %cst_10 = arith.constant dense<0xFF800000> : vector<8xf32>
    %30 = vector.multi_reduction <maximumf>, %29, %cst_10 [1] : vector<8x8xf32> to vector<8xf32>
    %31 = vector.shape_cast %30 : vector<8xf32> to vector<8x1xf32>
    %32 = vector.broadcast %31 : vector<8x1xf32> to vector<8x8xf32>
    %33 = arith.subf %29, %32 : vector<8x8xf32>
    %34 = math.exp %33 : vector<8x8xf32>
    %cst_11 = arith.constant dense<0.000000e+00> : vector<8xf32>
    %35 = vector.multi_reduction <add>, %34, %cst_11 [1] : vector<8x8xf32> to vector<8xf32>
    %36 = vector.shape_cast %35 : vector<8xf32> to vector<8x1xf32>
    %37 = tpu.reciprocal %36 {approx = true} : vector<8x1xf32> -> vector<8x1xf32>
    %38 = vector.broadcast %37 : vector<8x1xf32> to vector<8x8xf32>
    %39 = arith.mulf %34, %38 : vector<8x8xf32>
    %40 = arith.truncf %39 : vector<8x8xf32> to vector<8x8xbf16>
    %cst_12 = arith.constant dense<0.000000e+00> : vector<8x8xf32>
    %41 = tpu.matmul %40, %25, %cst_12 {dimension_numbers = #tpu.dot_dimension_numbers<[1], [0], [0], [1], [0, 0, 1, 1], [], []>} : vector<8x8xbf16>, vector<8x8xbf16>, vector<8x8xf32> -> vector<8x8xf32>
    %42 = vector.extract_strided_slice %2 {offsets = [0, 16], sizes = [8, 8], strides = [1, 1]} : vector<8x96xbf16> to vector<8x8xbf16>
    %43 = vector.extract_strided_slice %2 {offsets = [0, 48], sizes = [8, 8], strides = [1, 1]} : vector<8x96xbf16> to vector<8x8xbf16>
    %44 = vector.extract_strided_slice %2 {offsets = [0, 80], sizes = [8, 8], strides = [1, 1]} : vector<8x96xbf16> to vector<8x8xbf16>
    %cst_13 = arith.constant dense<0.000000e+00> : vector<8x8xf32>
    %45 = tpu.matmul %42, %43, %cst_13 {dimension_numbers = #tpu.dot_dimension_numbers<[1], [1], [0], [0], [0, 0, 1, 0], [], []>} : vector<8x8xbf16>, vector<8x8xbf16>, vector<8x8xf32> -> vector<8x8xf32>
    %cst_14 = arith.constant 0.353553385 : f32
    %46 = vector.broadcast %cst_14 : f32 to vector<8x8xf32>
    %47 = arith.mulf %45, %46 : vector<8x8xf32>
    %48 = arith.addf %47, %3 : vector<8x8xf32>
    %cst_15 = arith.constant dense<0xFF800000> : vector<8xf32>
    %49 = vector.multi_reduction <maximumf>, %48, %cst_15 [1] : vector<8x8xf32> to vector<8xf32>
    %50 = vector.shape_cast %49 : vector<8xf32> to vector<8x1xf32>
    %51 = vector.broadcast %50 : vector<8x1xf32> to vector<8x8xf32>
    %52 = arith.subf %48, %51 : vector<8x8xf32>
    %53 = math.exp %52 : vector<8x8xf32>
    %cst_16 = arith.constant dense<0.000000e+00> : vector<8xf32>
    %54 = vector.multi_reduction <add>, %53, %cst_16 [1] : vector<8x8xf32> to vector<8xf32>
    %55 = vector.shape_cast %54 : vector<8xf32> to vector<8x1xf32>
    %56 = tpu.reciprocal %55 {approx = true} : vector<8x1xf32> -> vector<8x1xf32>
    %57 = vector.broadcast %56 : vector<8x1xf32> to vector<8x8xf32>
    %58 = arith.mulf %53, %57 : vector<8x8xf32>
    %59 = arith.truncf %58 : vector<8x8xf32> to vector<8x8xbf16>
    %cst_17 = arith.constant dense<0.000000e+00> : vector<8x8xf32>
    %60 = tpu.matmul %59, %44, %cst_17 {dimension_numbers = #tpu.dot_dimension_numbers<[1], [0], [0], [1], [0, 0, 1, 1], [], []>} : vector<8x8xbf16>, vector<8x8xbf16>, vector<8x8xf32> -> vector<8x8xf32>
    %61 = vector.extract_strided_slice %2 {offsets = [0, 24], sizes = [8, 8], strides = [1, 1]} : vector<8x96xbf16> to vector<8x8xbf16>
    %62 = vector.extract_strided_slice %2 {offsets = [0, 56], sizes = [8, 8], strides = [1, 1]} : vector<8x96xbf16> to vector<8x8xbf16>
    %63 = vector.extract_strided_slice %2 {offsets = [0, 88], sizes = [8, 8], strides = [1, 1]} : vector<8x96xbf16> to vector<8x8xbf16>
    %cst_18 = arith.constant dense<0.000000e+00> : vector<8x8xf32>
    %64 = tpu.matmul %61, %62, %cst_18 {dimension_numbers = #tpu.dot_dimension_numbers<[1], [1], [0], [0], [0, 0, 1, 0], [], []>} : vector<8x8xbf16>, vector<8x8xbf16>, vector<8x8xf32> -> vector<8x8xf32>
    %cst_19 = arith.constant 0.353553385 : f32
    %65 = vector.broadcast %cst_19 : f32 to vector<8x8xf32>
    %66 = arith.mulf %64, %65 : vector<8x8xf32>
    %67 = arith.addf %66, %3 : vector<8x8xf32>
    %cst_20 = arith.constant dense<0xFF800000> : vector<8xf32>
    %68 = vector.multi_reduction <maximumf>, %67, %cst_20 [1] : vector<8x8xf32> to vector<8xf32>
    %69 = vector.shape_cast %68 : vector<8xf32> to vector<8x1xf32>
    %70 = vector.broadcast %69 : vector<8x1xf32> to vector<8x8xf32>
    %71 = arith.subf %67, %70 : vector<8x8xf32>
    %72 = math.exp %71 : vector<8x8xf32>
    %cst_21 = arith.constant dense<0.000000e+00> : vector<8xf32>
    %73 = vector.multi_reduction <add>, %72, %cst_21 [1] : vector<8x8xf32> to vector<8xf32>
    %74 = vector.shape_cast %73 : vector<8xf32> to vector<8x1xf32>
    %75 = tpu.reciprocal %74 {approx = true} : vector<8x1xf32> -> vector<8x1xf32>
    %76 = vector.broadcast %75 : vector<8x1xf32> to vector<8x8xf32>
    %77 = arith.mulf %72, %76 : vector<8x8xf32>
    %78 = arith.truncf %77 : vector<8x8xf32> to vector<8x8xbf16>
    %cst_22 = arith.constant dense<0.000000e+00> : vector<8x8xf32>
    %79 = tpu.matmul %78, %63, %cst_22 {dimension_numbers = #tpu.dot_dimension_numbers<[1], [0], [0], [1], [0, 0, 1, 1], [], []>} : vector<8x8xbf16>, vector<8x8xbf16>, vector<8x8xf32> -> vector<8x8xf32>
    %80 = tpu.concatenate %22, %41, %60, %79 in 1 : vector<8x8xf32>, vector<8x8xf32>, vector<8x8xf32>, vector<8x8xf32> -> vector<8x32xf32>
    %c0_23 = arith.constant 0 : index
    %c0_24 = arith.constant 0 : index
    %c0_25 = arith.constant 0 : index
    %81 = vector.load %arg3[%c0_23, %c0_24, %c0_25] : memref<1x8x32xf32, #tpu.memory_space<vmem>>, vector<1x8x32xf32>
    %82 = vector.shape_cast %81 : vector<1x8x32xf32> to vector<8x32xf32>
    %83 = vector.shape_cast %80 : vector<8x32xf32> to vector<1x8x32xf32>
    tpu.vector_store %arg3[%c0_23, %c0_24, %c0_25], %83 {strides = array<i32>} : memref<1x8x32xf32, #tpu.memory_space<vmem>>, vector<1x8x32xf32>,
    return
  }
  func.func @transform_0(%arg0: i32) -> (i32, i32, i32) {
    %c0_i32 = arith.constant 0 : i32
    %c0_i32_0 = arith.constant 0 : i32
    %c0_i32_1 = arith.constant 0 : i32
    return %arg0, %c0_i32, %c0_i32_0 : i32, i32, i32
  }
  func.func @transform_1(%arg0: i32) -> (i32, i32) {
    %c0_i32 = arith.constant 0 : i32
    %c0_i32_0 = arith.constant 0 : i32
    %c0_i32_1 = arith.constant 0 : i32
    return %c0_i32, %c0_i32_0 : i32, i32
  }
  func.func @transform_2(%arg0: i32) -> (i32, i32, i32) {
    %c0_i32 = arith.constant 0 : i32
    %c0_i32_0 = arith.constant 0 : i32
    %c0_i32_1 = arith.constant 0 : i32
    return %arg0, %c0_i32, %c0_i32_0 : i32, i32, i32
  }
}

module attributes {stable_mosaic.version = 11 : i64} {
  func.func @_layernorm_kernel(%arg0: i32, %arg1: memref<16x32xf32, #tpu.memory_space<vmem>>, %arg2: memref<1x32xf32, #tpu.memory_space<vmem>>, %arg3: memref<1x32xf32, #tpu.memory_space<vmem>>, %arg4: memref<16x32xf32, #tpu.memory_space<vmem>>) attributes {dimension_semantics = [#tpu.dimension_semantics<parallel>], iteration_bounds = array<i64: 1>, scalar_prefetch = 0 : i64, scratch_operands = 0 : i64, tpu.core_type = #tpu.core_type<tc>, window_params = [{transform_indices = @transform_0, window_bounds = array<i64: 16, 32>}, {pipeline_mode = #tpu.pipeline_mode<synchronous>, transform_indices = @transform_1, window_bounds = array<i64: 1, 32>}, {pipeline_mode = #tpu.pipeline_mode<synchronous>, transform_indices = @transform_2, window_bounds = array<i64: 1, 32>}, {transform_indices = @transform_3, window_bounds = array<i64: 16, 32>}]} {
    %c0 = arith.constant 0 : index
    %c0_0 = arith.constant 0 : index
    %0 = vector.load %arg1[%c0, %c0_0] : memref<16x32xf32, #tpu.memory_space<vmem>>, vector<16x32xf32>
    %cst = arith.constant dense<0.000000e+00> : vector<16xf32>
    %1 = vector.multi_reduction <add>, %0, %cst [1] : vector<16x32xf32> to vector<16xf32>
    %2 = vector.shape_cast %1 : vector<16xf32> to vector<16x1xf32>
    %cst_1 = arith.constant 3.200000e+01 : f32
    %3 = vector.broadcast %cst_1 : f32 to vector<16x1xf32>
    %4 = arith.divf %2, %3 : vector<16x1xf32>
    %5 = vector.broadcast %4 : vector<16x1xf32> to vector<16x32xf32>
    %6 = arith.subf %0, %5 : vector<16x32xf32>
    %7 = arith.mulf %6, %6 : vector<16x32xf32>
    %cst_2 = arith.constant dense<0.000000e+00> : vector<16xf32>
    %8 = vector.multi_reduction <add>, %7, %cst_2 [1] : vector<16x32xf32> to vector<16xf32>
    %9 = vector.shape_cast %8 : vector<16xf32> to vector<16x1xf32>
    %cst_3 = arith.constant 3.200000e+01 : f32
    %10 = vector.broadcast %cst_3 : f32 to vector<16x1xf32>
    %11 = arith.divf %9, %10 : vector<16x1xf32>
    %cst_4 = arith.constant 9.99999974E-6 : f32
    %12 = vector.broadcast %cst_4 : f32 to vector<16x1xf32>
    %13 = arith.addf %11, %12 : vector<16x1xf32>
    %14 = math.rsqrt %13 : vector<16x1xf32>
    %15 = vector.broadcast %14 : vector<16x1xf32> to vector<16x32xf32>
    %16 = arith.mulf %6, %15 : vector<16x32xf32>
    %c0_5 = arith.constant 0 : index
    %c0_6 = arith.constant 0 : index
    %17 = vector.load %arg2[%c0_5, %c0_6] : memref<1x32xf32, #tpu.memory_space<vmem>>, vector<1x32xf32>
    %18 = vector.broadcast %17 : vector<1x32xf32> to vector<16x32xf32>
    %19 = arith.mulf %16, %18 : vector<16x32xf32>
    %c0_7 = arith.constant 0 : index
    %c0_8 = arith.constant 0 : index
    %20 = vector.load %arg3[%c0_7, %c0_8] : memref<1x32xf32, #tpu.memory_space<vmem>>, vector<1x32xf32>
    %21 = vector.broadcast %20 : vector<1x32xf32> to vector<16x32xf32>
    %22 = arith.addf %19, %21 : vector<16x32xf32>
    %c0_9 = arith.constant 0 : index
    %c0_10 = arith.constant 0 : index
    %23 = vector.load %arg4[%c0_9, %c0_10] : memref<16x32xf32, #tpu.memory_space<vmem>>, vector<16x32xf32>
    tpu.vector_store %arg4[%c0_9, %c0_10], %22 {strides = array<i32>} : memref<16x32xf32, #tpu.memory_space<vmem>>, vector<16x32xf32>,
    return
  }
  func.func @transform_0(%arg0: i32) -> (i32, i32) {
    %c0_i32 = arith.constant 0 : i32
    %c0_i32_0 = arith.constant 0 : i32
    return %arg0, %c0_i32 : i32, i32
  }
  func.func @transform_1(%arg0: i32) -> (i32, i32) {
    %c0_i32 = arith.constant 0 : i32
    %c0_i32_0 = arith.constant 0 : i32
    %c0_i32_1 = arith.constant 0 : i32
    return %c0_i32, %c0_i32_0 : i32, i32
  }
  func.func @transform_2(%arg0: i32) -> (i32, i32) {
    %c0_i32 = arith.constant 0 : i32
    %c0_i32_0 = arith.constant 0 : i32
    %c0_i32_1 = arith.constant 0 : i32
    return %c0_i32, %c0_i32_0 : i32, i32
  }
  func.func @transform_3(%arg0: i32) -> (i32, i32) {
    %c0_i32 = arith.constant 0 : i32
    %c0_i32_0 = arith.constant 0 : i32
    return %arg0, %c0_i32 : i32, i32
  }
}

</mosaic_0001>

<bundles_post_ra>
// kernel: clip_text_encoder.11
= control target key start
LH: loop header
LB: loop body
LE: loop exit
PB: predicated region body
PF: predicated region fallthrough
CT: control target
= control target key end

     0   :  { %vm37_vm0 = vcmask 261120   ;;  %s135_s1 = inlined_call_operand.vmem [shape: bf16[32,32], index: 1, kind: input, shape index: {}]   ;;  %s136_s0 = inlined_call_operand.vmem [shape: f32[16,32], index: 0, kind: input, shape index: {}]   ;;  %s137_s2 = inlined_call_operand.vmem [shape: f32[1,32], index: 2, kind: input, shape index: {}]   ;;  %s138_s3 = inlined_call_operand.vmem [shape: f32[16,32], index: 3, kind: input, shape index: {}]   ;;  %s139_s4 = inlined_call_operand.vmem [shape: f32[16,32], index: 4, kind: output, shape index: {}]  }
   0x1   :  { %v81_v0 = vld [vmem:[%s135_s1 + $0x8] sm:$0xff]  ;;  %v80_v1 = vld [vmem:[%s135_s1] sm:$0xff] }
   0x2   :  { %47 = vmatpush.bf16.msra.mxu0 %v81_v0  ;;  %v18_v2 = vld [vmem:[%s136_s0] sm:$0xff]  ;;  %v19_v3 = vld [vmem:[%s136_s0 + $0x8] sm:$0xff] }
   0x3   :  { %v20_v4 = vpack.c.bf16 %v19_v3, %v18_v2  ;;  %v55_v5 = vld [vmem:[%s138_s3] sm:$0xff]  ;;  %v56_v10 = vld [vmem:[%s138_s3 + $0x8] sm:$0xff] }
   0x4   :  { %v82_v6 = vld [vmem:[%s137_s2] ss:$0 sm:$0xff] }
   0x6   :  { %48 = vmatpush.bf16.msra.mxu0 %v80_v1 }
   0x9   :  { %79 = vmatmul.msk.bf16.vlgmr.msra.gmra.mxu0 %vm37_vm0, %v20_v4 }
  0x86   :  { %v50_v7 = vpop.f32.mrf.mxu0 }
  0x87   :  { %v57_v8 = vadd.f32 %v55_v5, %v50_v7 }
  0x89   :  { %v63_v9 = vadd.f32 %v82_v6, %v57_v8 }
  0x8b   :  { %65 = vst.msk [vmem:[%s139_s4] sm:$0xff] %vm37_vm0, %v63_v9 }
  0x8e   :  { %v52_v11 = vpop.f32.mrf.mxu0 }
  0x8f   :  { %v58_v12 = vadd.f32 %v56_v10, %v52_v11 }
  0x91   :  { %v64_v13 = vadd.f32 %v82_v6, %v58_v12 }
  0x93   :  { %66 = vst.msk [vmem:[%s139_s4 + $0x8] sm:$0xff] %vm37_vm0, %v64_v13 }

// kernel: clip_text_encoder.12
= control target key start
LH: loop header
LB: loop body
LE: loop exit
PB: predicated region body
PF: predicated region fallthrough
CT: control target
= control target key end

     0   :  { %vm29_vm0 = vcmask 261120   ;;  %v289_v4 = vmov 32.0   ;;  %s389_s0 = inlined_call_operand.vmem [shape: f32[16,32], index: 0, kind: input, shape index: {}]   ;;  %s390_s1 = inlined_call_operand.vmem [shape: f32[1,32], index: 1, kind: input, shape index: {}]   ;;  %s391_s2 = inlined_call_operand.vmem [shape: f32[1,32], index: 2, kind: input, shape index: {}]   ;;  %s392_s4 = inlined_call_operand.vmem [shape: f32[1,64], index: 4, kind: input, shape index: {}]   ;;  %s393_s3 = inlined_call_operand.vmem [shape: bf16[32,64], index: 3, kind: input, shape index: {}]   ;;  %s394_s6 = inlined_call_operand.vmem [shape: f32[1,32], index: 6, kind: input, shape index: {}]   ;;  %s395_s5 = inlined_call_operand.vmem [shape: bf16[64,32], index: 5, kind: input, shape index: {}]   ;;  %s396_s7 = inlined_call_operand.vmem [shape: f32[16,32], index: 7, kind: output, shape index: {}]  }
   0x1   :  { %v333_v0 = vld [vmem:[%s389_s0] sm:$0xff]  ;;  %v340_v2 = vld [vmem:[%s389_s0 + $0x8] sm:$0xff]  ;;  %275 = vrcp.f32 %v289_v4  ;;  %v269_v52 = vld [vmem:[%s395_s5 + $0x18] sm:$0xff] }
   0x2   :  { %v30_v1 = vsel %vm29_vm0, %v333_v0, 0.0  ;;  %v33_v3 = vsel %vm29_vm0, %v340_v2, 0.0  ;;  %v265_v21 = vld [vmem:[%s393_s3 + $0x8] sm:$0xff]  ;;  %v264_v23 = vld [vmem:[%s393_s3] sm:$0xff]  ;;  %218 = vmatpush.bf16.msra.mxu1 %v269_v52  ;;  %v268_v55 = vld [vmem:[%s395_s5 + $0x10] sm:$0xff] }
   0x3   :  { %31 = vadd.xlane.f32.xlu0 %v30_v1  ;;  %123 = vmatpush.bf16.msra.mxu0 %v265_v21  ;;  %v271_v42 = vld [vmem:[%s390_s1] ss:$0 sm:$0xff]  ;;  %v267_v58 = vld [vmem:[%s395_s5 + $0x8] sm:$0xff] }
   0x4   :  { %v272_v47 = vld [vmem:[%s391_s2] ss:$0 sm:$0xff] }
   0x5   :  { %v273_v53 = vld [vmem:[%s392_s4] ss:$0 sm:$0xff] }
   0x6   :  { %219 = vmatpush.bf16.msra.mxu1 %v268_v55  ;;  %v266_v61 = vld [vmem:[%s395_s5] sm:$0xff] }
   0x7   :  { %v276_v5 = vpop.eup %275  ;;  %124 = vmatpush.bf16.msra.mxu0 %v264_v23 }
   0x8   :  { %v37_v6 = vmul.f32 32.0, %v276_v5  ;;  %vm41_vm1 = vweird.f32 %v276_v5 }
   0xa   :  { %v38_v7 = vsub.f32 1.0, %v37_v6  ;;  %220 = vmatpush.bf16.msra.mxu1 %v267_v58 }
   0xb   :  { %34 = vadd.xlane.f32.xlu0 %v33_v3 }
   0xc   :  { %v39_v8 = vmul.f32 %v276_v5, %v38_v7 }
   0xe   :  { %v40_v9 = vadd.f32 %v276_v5, %v39_v8  ;;  %221 = vmatpush.bf16.msra.mxu1 %v266_v61 }
  0x10   :  { %v42_v10 = vsel %vm41_vm1, %v276_v5, %v40_v9  ;;  %vm210_vm1 = vcmask 523264  }
  0x76   :  { %v32_v11 = vpop.xlane.xlu0 %31 }
  0x77   :  { %v43_v12 = vmul.f32 %v42_v10, %v32_v11 }
  0x79   :  { %v45_v13 = vsub.f32 %v333_v0, %v43_v12 }
  0x7b   :  { %v47_v14 = vmul.f32 %v45_v13, %v45_v13 }
  0x7d   :  { %v49_v15 = vsel %vm29_vm0, %v47_v14, 0.0 }
  0x7e   :  { %50 = vadd.xlane.f32.xlu1 %v49_v15  ;;  %v35_v16 = vpop.xlane.xlu0 %34 }
  0x7f   :  { %v44_v17 = vmul.f32 %v42_v10, %v35_v16 }
  0x81   :  { %v46_v18 = vsub.f32 %v340_v2, %v44_v17 }
  0x83   :  { %v48_v19 = vmul.f32 %v46_v18, %v46_v18 }
  0x85   :  { %v52_v20 = vsel %vm29_vm0, %v48_v19, 0.0 }
  0x86   :  { %53 = vadd.xlane.f32.xlu1 %v52_v20 }
  0xf1   :  { %v51_v22 = vpop.xlane.xlu1 %50 }
  0xf2   :  { %v55_v24 = vmul.f32 %v51_v22, %v42_v10 }
  0xf4   :  { %v57_v25 = vadd.f32 1e-05, %v55_v24 }
  0xf6   :  { %277 = vrsqrt.f32 %v57_v25  ;;  %vm65_vm3 = vweird.f32 %v57_v25 }
  0xf9   :  { %v54_v26 = vpop.xlane.xlu1 %53 }
  0xfa   :  { %v56_v27 = vmul.f32 %v54_v26, %v42_v10 }
  0xfc   :  { %v278_v28 = vpop.eup %277  ;;  %v58_v29 = vadd.f32 1e-05, %v56_v27 }
  0xfd   :  { %v60_v30 = vmul.f32 %v278_v28, %v57_v25  ;;  %vm66_vm2 = vweird.f32 %v278_v28 }
  0xfe   :  { %279 = vrsqrt.f32 %v58_v29  ;;  %vm67_vm4 = vmor %vm65_vm3, %vm66_vm2  ;;  %vm75_vm6 = vweird.f32 %v58_v29 }
  0xff   :  { %v61_v31 = vmul.f32 %v278_v28, %v60_v30  ;;  %v274_v30 = vld [vmem:[%s394_s6] ss:$0 sm:$0xff] }
 0x101   :  { %v62_v32 = vmul.f32 0.5, %v61_v31 }
 0x103   :  { %v63_v33 = vsub.f32 1.5, %v62_v32 }
 0x104   :  { %v280_v34 = vpop.eup %279 }
 0x105   :  { %v64_v35 = vmul.f32 %v278_v28, %v63_v33  ;;  %v70_v36 = vmul.f32 %v280_v34, %v58_v29  ;;  %vm76_vm5 = vweird.f32 %v280_v34 }
 0x106   :  { %vm77_vm7 = vmor %vm75_vm6, %vm76_vm5 }
 0x107   :  { %v71_v37 = vmul.f32 %v280_v34, %v70_v36  ;;  %v68_v38 = vsel %vm67_vm4, %v278_v28, %v64_v35 }
 0x108   :  { %v79_v41 = vmul.f32 %v68_v38, %v45_v13 }
 0x109   :  { %v72_v39 = vmul.f32 0.5, %v71_v37 }
 0x10a   :  { %v85_v46 = vmul.f32 %v271_v42, %v79_v41 }
 0x10b   :  { %v73_v40 = vsub.f32 1.5, %v72_v39 }
 0x10c   :  { %v91_v49 = vadd.f32 %v272_v47, %v85_v46 }
 0x10d   :  { %v74_v43 = vmul.f32 %v280_v34, %v73_v40 }
 0x10f   :  { %v78_v44 = vsel %vm77_vm7, %v280_v34, %v74_v43 }
 0x110   :  { %v80_v45 = vmul.f32 %v78_v44, %v46_v18 }
 0x112   :  { %v86_v48 = vmul.f32 %v271_v42, %v80_v45 }
 0x114   :  { %v92_v50 = vadd.f32 %v272_v47, %v86_v48 }
 0x116   :  { %v93_v51 = vpack.c.bf16 %v92_v50, %v91_v49 }
 0x118   :  { %244 = vmatmul.msk.bf16.vlgmr.msra.gmra.mxu0 %vm29_vm0, %v93_v51 }
 0x195   :  { %v126_v54 = vpop.f32.mrf.mxu0 }
 0x196   :  { %v127_v56 = vadd.f32 %v273_v53, %v126_v54 }
 0x198   :  { %v245_v57 = vmul.f32 -1.702, %v127_v56 }
 0x19a   :  { %v135_v59 = vmul.f32 1.442695, %v245_v57 }
 0x19c   :  { %281 = vpow2.f32 %v135_v59 }
 0x19d   :  { %v128_v60 = vpop.f32.mrf.mxu0 }
 0x19e   :  { %v129_v62 = vadd.f32 %v273_v53, %v128_v60 }
 0x1a0   :  { %v246_v63 = vmul.f32 -1.702, %v129_v62 }
 0x1a2   :  { %v282_v1 = vpop.eup %281  ;;  %v137_v3 = vmul.f32 1.442695, %v246_v63 }
 0x1a3   :  { %v139_v4 = vadd.f32 1.0, %v282_v1 }
 0x1a4   :  { %283 = vpow2.f32 %v137_v3 }
 0x1a5   :  { %285 = vrcp.f32 %v139_v4  ;;  %v152_v14 = vand.u32 2147483648, %v139_v4  ;;  %vm146_vm9 = vweird.f32 %v139_v4  ;;  %v150_v15 = vand.u32 2147483647, %v139_v4 }
 0x1a7   :  { %v153_v21 = vor.u32 1.1754944e-38, %v152_v14  ;;  %vm151_vm12 = vcmp.eq.f32.partialorder %v150_v15, 8.507059e+37 }
 0x1aa   :  { %v284_v5 = vpop.eup %283 }
 0x1ab   :  { %v286_v6 = vpop.eup %285  ;;  %v140_v7 = vadd.f32 1.0, %v284_v5 }
 0x1ac   :  { %v142_v8 = vmul.f32 %v286_v6, %v139_v4  ;;  %vm147_vm8 = vweird.f32 %v286_v6 }
 0x1ad   :  { %287 = vrcp.f32 %v140_v7  ;;  %vm148_vm10 = vmor %vm146_vm9, %vm147_vm8  ;;  %v167_v17 = vand.u32 2147483648, %v140_v7  ;;  %v165_v20 = vand.u32 2147483647, %v140_v7  ;;  %vm161_vm13 = vweird.f32 %v140_v7 }
 0x1ae   :  { %v143_v9 = vsub.f32 1.0, %v142_v8 }
 0x1af   :  { %v168_v24 = vor.u32 1.1754944e-38, %v167_v17  ;;  %vm166_vm15 = vcmp.eq.f32.partialorder %v165_v20, 8.507059e+37 }
 0x1b0   :  { %v144_v10 = vmul.f32 %v286_v6, %v143_v9 }
 0x1b2   :  { %v145_v12 = vadd.f32 %v286_v6, %v144_v10 }
 0x1b3   :  { %v288_v11 = vpop.eup %287 }
 0x1b4   :  { %v157_v13 = vmul.f32 %v288_v11, %v140_v7  ;;  %v149_v18 = vsel %vm148_vm10, %v286_v6, %v145_v12  ;;  %vm162_vm11 = vweird.f32 %v288_v11 }
 0x1b5   :  { %v154_v23 = vsel %vm151_vm12, %v153_v21, %v149_v18  ;;  %vm163_vm14 = vmor %vm161_vm13, %vm162_vm11 }
 0x1b6   :  { %v158_v16 = vsub.f32 1.0, %v157_v13  ;;  %v171_v27 = vmul.f32 %v154_v23, %v127_v56 }
 0x1b8   :  { %v159_v19 = vmul.f32 %v288_v11, %v158_v16 }
 0x1ba   :  { %v160_v22 = vadd.f32 %v288_v11, %v159_v19 }
 0x1bc   :  { %v164_v25 = vsel %vm163_vm14, %v288_v11, %v160_v22 }
 0x1bd   :  { %v169_v26 = vsel %vm166_vm15, %v168_v24, %v164_v25 }
 0x1be   :  { %v172_v28 = vmul.f32 %v169_v26, %v129_v62 }
 0x1c0   :  { %v173_v29 = vpack.c.bf16 %v172_v28, %v171_v27 }
 0x1c2   :  { %263 = vmatmul.msk.bf16.vlgmr.msra.gmra.mxu1 %vm210_vm1, %v173_v29 }
 0x23f   :  { %v223_v31 = vpop.f32.mrf.mxu1 }
 0x240   :  { %v224_v32 = vadd.f32 %v274_v30, %v223_v31 }
 0x242   :  { %v228_v33 = vadd.f32 %v224_v32, %v333_v0 }
 0x244   :  { %230 = vst.msk [vmem:[%s396_s7] sm:$0xff] %vm29_vm0, %v228_v33 }
 0x247   :  { %v225_v34 = vpop.f32.mrf.mxu1 }
 0x248   :  { %v226_v35 = vadd.f32 %v274_v30, %v225_v34 }
 0x24a   :  { %v229_v36 = vadd.f32 %v226_v35, %v340_v2 }
 0x24c   :  { %231 = vst.msk [vmem:[%s396_s7 + $0x8] sm:$0xff] %vm29_vm0, %v229_v36 }

// kernel: clip_text_encoder.9
= control target key start
LH: loop header
LB: loop body
LE: loop exit
PB: predicated region body
PF: predicated region fallthrough
CT: control target
= control target key end

     0   :  { %vm23_vm0 = vcmask 261120   ;;  %v153_v4 = vmov 32.0   ;;  %vm125_vm8 = vcmask 785408   ;;  %s216_s0 = inlined_call_operand.vmem [shape: f32[16,32], index: 0, kind: input, shape index: {}]   ;;  %s217_s1 = inlined_call_operand.vmem [shape: f32[1,32], index: 1, kind: input, shape index: {}]   ;;  %s218_s2 = inlined_call_operand.vmem [shape: f32[1,32], index: 2, kind: input, shape index: {}]   ;;  %s219_s4 = inlined_call_operand.vmem [shape: f32[1,96], index: 4, kind: input, shape index: {}]   ;;  %s220_s3 = inlined_call_operand.vmem [shape: bf16[32,96], index: 3, kind: input, shape index: {}]   ;;  %s221_s5 = inlined_call_operand.vmem [shape: f32[16,96], index: 5, kind: output, shape index: {}]  }
   0x1   :  { %v21_v0 = vld [vmem:[%s216_s0] sm:$0xff]  ;;  %v22_v2 = vld [vmem:[%s216_s0 + $0x8] sm:$0xff]  ;;  %147 = vrcp.f32 %v153_v4 }
   0x2   :  { %v24_v1 = vsel %vm23_vm0, %v21_v0, 0.0  ;;  %v27_v3 = vsel %vm23_vm0, %v22_v2, 0.0  ;;  %v142_v21 = vld [vmem:[%s220_s3 + $0x8] sm:$0xff]  ;;  %v141_v23 = vld [vmem:[%s220_s3] sm:$0xff] }
   0x3   :  { %25 = vadd.xlane.f32.xlu0 %v24_v1  ;;  %117 = vmatpush.bf16.msra.mxu0 %v142_v21  ;;  %v144_v42 = vld [vmem:[%s217_s1] ss:$0 sm:$0xff] }
   0x4   :  { %v145_v47 = vld [vmem:[%s218_s2] ss:$0 sm:$0xff] }
   0x5   :  { %v146_v52 = vld [vmem:[%s219_s4] ss:$0 sm:$0xff] }
   0x7   :  { %v148_v5 = vpop.eup %147  ;;  %118 = vmatpush.bf16.msra.mxu0 %v141_v23 }
   0x8   :  { %v31_v6 = vmul.f32 32.0, %v148_v5  ;;  %vm35_vm1 = vweird.f32 %v148_v5 }
   0xa   :  { %v32_v7 = vsub.f32 1.0, %v31_v6 }
   0xb   :  { %28 = vadd.xlane.f32.xlu0 %v27_v3 }
   0xc   :  { %v33_v8 = vmul.f32 %v148_v5, %v32_v7 }
   0xe   :  { %v34_v9 = vadd.f32 %v148_v5, %v33_v8 }
  0x10   :  { %v36_v10 = vsel %vm35_vm1, %v148_v5, %v34_v9 }
  0x76   :  { %v26_v11 = vpop.xlane.xlu0 %25 }
  0x77   :  { %v37_v12 = vmul.f32 %v36_v10, %v26_v11 }
  0x79   :  { %v39_v13 = vsub.f32 %v21_v0, %v37_v12 }
  0x7b   :  { %v41_v14 = vmul.f32 %v39_v13, %v39_v13 }
  0x7d   :  { %v43_v15 = vsel %vm23_vm0, %v41_v14, 0.0 }
  0x7e   :  { %44 = vadd.xlane.f32.xlu1 %v43_v15  ;;  %v29_v16 = vpop.xlane.xlu0 %28 }
  0x7f   :  { %v38_v17 = vmul.f32 %v36_v10, %v29_v16 }
  0x81   :  { %v40_v18 = vsub.f32 %v22_v2, %v38_v17 }
  0x83   :  { %v42_v19 = vmul.f32 %v40_v18, %v40_v18 }
  0x85   :  { %v46_v20 = vsel %vm23_vm0, %v42_v19, 0.0 }
  0x86   :  { %47 = vadd.xlane.f32.xlu1 %v46_v20 }
  0xf1   :  { %v45_v22 = vpop.xlane.xlu1 %44 }
  0xf2   :  { %v49_v24 = vmul.f32 %v45_v22, %v36_v10 }
  0xf4   :  { %v51_v25 = vadd.f32 1e-05, %v49_v24 }
  0xf6   :  { %149 = vrsqrt.f32 %v51_v25  ;;  %vm59_vm3 = vweird.f32 %v51_v25 }
  0xf9   :  { %v48_v26 = vpop.xlane.xlu1 %47 }
  0xfa   :  { %v50_v27 = vmul.f32 %v48_v26, %v36_v10 }
  0xfc   :  { %v150_v28 = vpop.eup %149  ;;  %v52_v29 = vadd.f32 1e-05, %v50_v27 }
  0xfd   :  { %v54_v30 = vmul.f32 %v150_v28, %v51_v25  ;;  %vm60_vm2 = vweird.f32 %v150_v28 }
  0xfe   :  { %151 = vrsqrt.f32 %v52_v29  ;;  %vm61_vm4 = vmor %vm59_vm3, %vm60_vm2  ;;  %vm69_vm6 = vweird.f32 %v52_v29 }
  0xff   :  { %v55_v31 = vmul.f32 %v150_v28, %v54_v30 }
 0x101   :  { %v56_v32 = vmul.f32 0.5, %v55_v31 }
 0x103   :  { %v57_v33 = vsub.f32 1.5, %v56_v32 }
 0x104   :  { %v152_v34 = vpop.eup %151 }
 0x105   :  { %v58_v35 = vmul.f32 %v150_v28, %v57_v33  ;;  %v64_v36 = vmul.f32 %v152_v34, %v52_v29  ;;  %vm70_vm5 = vweird.f32 %v152_v34 }
 0x106   :  { %vm71_vm7 = vmor %vm69_vm6, %vm70_vm5 }
 0x107   :  { %v65_v37 = vmul.f32 %v152_v34, %v64_v36  ;;  %v62_v38 = vsel %vm61_vm4, %v150_v28, %v58_v35 }
 0x108   :  { %v73_v41 = vmul.f32 %v62_v38, %v39_v13 }
 0x109   :  { %v66_v39 = vmul.f32 0.5, %v65_v37 }
 0x10a   :  { %v79_v46 = vmul.f32 %v144_v42, %v73_v41 }
 0x10b   :  { %v67_v40 = vsub.f32 1.5, %v66_v39 }
 0x10c   :  { %v85_v49 = vadd.f32 %v145_v47, %v79_v46 }
 0x10d   :  { %v68_v43 = vmul.f32 %v152_v34, %v67_v40 }
 0x10f   :  { %v72_v44 = vsel %vm71_vm7, %v152_v34, %v68_v43 }
 0x110   :  { %v74_v45 = vmul.f32 %v72_v44, %v40_v18 }
 0x112   :  { %v80_v48 = vmul.f32 %v144_v42, %v74_v45 }
 0x114   :  { %v86_v50 = vadd.f32 %v145_v47, %v80_v48 }
 0x116   :  { %v87_v51 = vpack.c.bf16 %v86_v50, %v85_v49 }
 0x118   :  { %140 = vmatmul.msk.bf16.vlgmr.msra.gmra.mxu0 %vm23_vm0, %v87_v51 }
 0x195   :  { %v120_v53 = vpop.f32.mrf.mxu0 }
 0x196   :  { %v121_v54 = vadd.f32 %v146_v52, %v120_v53 }
 0x198   :  { %126 = vst.msk [vmem:[%s221_s5] sm:$0xff] %vm125_vm8, %v121_v54 }
 0x19d   :  { %v122_v55 = vpop.f32.mrf.mxu0 }
 0x19e   :  { %v123_v56 = vadd.f32 %v146_v52, %v122_v55 }
 0x1a0   :  { %127 = vst.msk [vmem:[%s221_s5 + $0x8] sm:$0xff] %vm125_vm8, %v123_v56 }

// kernel: clip_text_encoder.10
= control target key start
LH: loop header
LB: loop body
LE: loop exit
PB: predicated region body
PF: predicated region fallthrough
CT: control target
= control target key end

     0   :  { %s542_s9 = smov 0   ;;  %s610_s0 = inlined_call_operand.vmem [shape: f32[2,8,96], index: 0, kind: input, shape index: {}]   ;;  %s611_s1 = inlined_call_operand.vmem [shape: f32[8,8], index: 1, kind: input, shape index: {}]   ;;  %s612_s2 = inlined_call_operand.vmem [shape: f32[2,8,32], index: 2, kind: output, shape index: {}]  }
   0x1 LB: > { %s450_s10 = sadd.s32 4294967295, %s511_s9   ;;  %p454_p0 = scmp.ge.s32.totalorder %s511_s9, 1  ;;  %s511_s9 = sphi %s542_s9, %s12_s9  }
   0x2   : > { %p111_p1 = scmp.lt.s32.totalorder %s511_s9, 3 }
   0x4   : > { %p112_p2 = pnand %p454_p0, %p111_p1 }
   0x5   : > { %p131_p3 = scmp.lt.s32.totalorder (!%p112_p2), %s450_s10, 1  ;;  %s513_s15 = smov (!%p112_p2), 96  }
   0x6   : > { %115 = sbr.rel (%p112_p2) target bundleno = 1201 (0x4b1), region = 28  ;;  %s514_s16 = smov (!%p112_p2), 88  }
   0x7   : > { %s515_s17 = smov (!%p112_p2), 120   ;;  %s516_s18 = smov (!%p112_p2), 64  }
   0x8   : > { %s517_s19 = smov (!%p112_p2), 80   ;;  %s518_s20 = smov (!%p112_p2), 72  }
   0x9   : > { %s519_s21 = smov (!%p112_p2), 112   ;;  %s520_s22 = smov (!%p112_p2), 104  }
   0xa   : > { %s521_s25 = smov (!%p112_p2), 56   ;;  %s522_s26 = smov (!%p112_p2), 40  }
   0xb   : > { %s614_s10 = smov (!%p131_p3, %s450_s10), 1  ;;  %vm148_vm0 = vcmask 64512   ;;  %v142_v10 = vld [vmem:[%s611_s1] sm:$0xff]  ;;  %vm187_vm1 = vcmask 1043456   ;;  %s523_s27 = smov 48   ;;  %vm391_vm2 = vcmask 130048  }
   0xc   : > { %s455_s11 = sshll.u32 %s614_s10, 3  ;;  %s524_s28 = smov 8   ;;  %vm393_vm3 = vcmask 195584   ;;  %vm395_vm4 = vcmask 261120  }
   0xd   : > { %s134_s14 = scalar_lea.vmem %s610_s0, %s455_s11  ;;  %s525_s29 = smov 16  }
   0xe   : > { %v140_v0 = vld [vmem:[%s134_s14] sm:$0xff]  ;;  %s526_s30 = smov 24   ;;  %s138_s5 = scalar_lea.vmem %s612_s2, %s455_s11 }
   0xf   : > { %v141_v1 = vpack.c.bf16 %v140_v0, %v140_v0 }
  0x11   : > { %v144_v2 = vunpack.c.l.b16 %v141_v1 }
  0x13   : > { %v558_v3 = vpack.c.b16 %v144_v2, %v144_v2 }
  0x15   : > { %146 = vrot.lane.b32.xlu0 %v558_v3, %s513_s15  ;;  %206 = vrot.lane.b32.xlu1 %v558_v3, %s514_s16 }
  0x16   : > { %204 = vrot.lane.b32.xlu2 %v558_v3, %s515_s17 }
  0x1e   : > { %182 = vrot.lane.b32.xlu2 %v558_v3, %s516_s18 }
  0x26   : > { %264 = vrot.lane.b32.xlu2 %v558_v3, %s517_s19 }
  0x2e   : > { %322 = vrot.lane.b32.xlu2 %v558_v3, %s518_s20 }
  0x36   : > { %262 = vrot.lane.b32.xlu2 %v558_v3, %s519_s21 }
  0x3e   : > { %320 = vrot.lane.b32.xlu2 %v558_v3, %s520_s22 }
  0x70   : > { %v205_v8 = vpop.permute.xlu2 %204 }
  0x78   : > { %v183_v15 = vpop.permute.xlu2 %182 }
  0x79   : > { %v189_v20 = vsel %vm187_vm1, %v183_v15, 0 }
  0x7a   : > { %198 = vmatpush.bf16.msra.mxu1 %v189_v20 }
  0x80   : > { %v265_v16 = vpop.permute.xlu2 %264 }
  0x81   : > { %v270_v18 = vsel %vm148_vm0, %v265_v16, 0 }
  0x82   : > { %279 = vmatpush.bf16.xpose.msrb.mxu1 %v270_v18 }
  0x87   : > { %v147_v4 = vpop.permute.xlu0 %146  ;;  %v207_v6 = vpop.permute.xlu1 %206 }
  0x88   : > { %v153_v5 = vsel %vm148_vm0, %v147_v4, 0  ;;  %v212_v7 = vsel %vm148_vm0, %v207_v6, 0  ;;  %v323_v17 = vpop.permute.xlu2 %322 }
  0x89   : > { %162 = vmatpush.bf16.xpose.msra.mxu0 %v153_v5  ;;  %221 = vmatpush.bf16.xpose.msra.mxu2 %v212_v7  ;;  %v328_v19 = vsel %vm148_vm0, %v323_v17, 0 }
  0x90   : > { %457 = vmatmul.msk.bf16.vlgmr.msra.gmra.mxu0 %vm148_vm0, %v141_v1  ;;  %459 = vmatmul.msk.bf16.vlgmr.msra.gmra.mxu2 %vm148_vm0, %v205_v8  ;;  %v263_v21 = vpop.permute.xlu2 %262 }
  0x91   : > { %337 = vmatpush.bf16.xpose.msrb.mxu0 %v328_v19 }
  0x98   : > { %v321_v24 = vpop.permute.xlu2 %320 }
  0xa0   : > { %463 = vmatmul.msk.bf16.vlgmr.msrb.gmra.mxu0 %vm148_vm0, %v321_v24 }
 0x10d   : > { %v164_v9 = vpop.f32.mrf.mxu0 }
 0x10e   : > { %v168_v11 = vmul.f32 0.35355338, %v164_v9 }
 0x110   : > { %v169_v12 = vadd.f32 %v168_v11, %v142_v10 }
 0x112   : > { %v170_v13 = vsel %vm148_vm0, %v169_v12, -inf }
 0x113   : > { %171 = vmax.xlane.f32.xlu0 %v170_v13  ;;  %v223_v22 = vpop.f32.mrf.mxu2 }
 0x114   : > { %v227_v23 = vmul.f32 0.35355338, %v223_v22 }
 0x115   : > { %v166_v14 = vpop.f32.mrf.mxu0 }
 0x116   : > { %v228_v25 = vadd.f32 %v227_v23, %v142_v10 }
 0x118   : > { %v229_v27 = vsel %vm148_vm0, %v228_v25, -inf }
 0x119   : > { %230 = vmax.xlane.f32.xlu2 %v229_v27 }
 0x11b   : > { %v225_v30 = vpop.f32.mrf.mxu2 }
 0x11d   : > { %v339_v33 = vpop.f32.mrf.mxu0 }
 0x11e   : > { %v343_v34 = vmul.f32 0.35355338, %v339_v33 }
 0x120   : > { %v344_v35 = vadd.f32 %v343_v34, %v142_v10 }
 0x122   : > { %v345_v37 = vsel %vm148_vm0, %v344_v35, -inf }
 0x125   : > { %v341_v38 = vpop.f32.mrf.mxu0 }
 0x186   : > { %v172_v26 = vpop.xlane.xlu0 %171 }
 0x187   : > { %v173_v28 = vsub.f32 %v169_v12, %v172_v26 }
 0x189   : > { %v174_v29 = vmul.f32 1.442695, %v173_v28 }
 0x18b   : > { %489 = vpow2.f32 %v174_v29 }
 0x18c   : > { %v231_v44 = vpop.xlane.xlu2 %230 }
 0x18d   : > { %v232_v45 = vsub.f32 %v228_v25, %v231_v44 }
 0x18f   : > { %v233_v46 = vmul.f32 1.442695, %v232_v45 }
 0x191   : > { %v490_v31 = vpop.eup %489 }
 0x192   : > { %v176_v32 = vsel %vm148_vm0, %v490_v31, 0.0 }
 0x193   : > { %177 = vadd.xlane.f32.xlu1 %v176_v32 }
 0x19b   : > { %346 = vmax.xlane.f32.xlu1 %v345_v37 }
 0x1b4   : > { %241 = vrot.lane.b32.xlu1 %v558_v3, %s521_s25 }
 0x1bc   : > { %357 = vrot.lane.b32.xlu1 %v558_v3, %s522_s26 }
 0x206   : > { %v178_v36 = vpop.xlane.xlu1 %177 }
 0x207   : > { %491 = vrcp.f32 %v178_v36 }
 0x208   : > { %493 = vpow2.f32 %v233_v46 }
 0x20d   : > { %v492_v39 = vpop.eup %491 }
 0x20e   : > { %v180_v40 = vmul.f32 %v492_v39, %v490_v31  ;;  %v347_v48 = vpop.xlane.xlu1 %346  ;;  %v494_v55 = vpop.eup %493 }
 0x20f   : > { %v348_v51 = vsub.f32 %v344_v35, %v347_v48  ;;  %v235_v56 = vsel %vm148_vm0, %v494_v55, 0.0 }
 0x210   : > { %v181_v41 = vpack.c.bf16 %v180_v40, %v180_v40 }
 0x211   : > { %v349_v53 = vmul.f32 1.442695, %v348_v51 }
 0x212   : > { %458 = vmatmul.msk.bf16.vlgmr.msra.gmra.mxu1 %vm148_vm0, %v181_v41 }
 0x213   : > { %495 = vpow2.f32 %v349_v53 }
 0x219   : > { %v496_v57 = vpop.eup %495 }
 0x21a   : > { %v351_v58 = vsel %vm148_vm0, %v496_v57, 0.0 }
 0x222   : > { %461 = vmatmul.msk.bf16.vlgmr.msrb.gmra.mxu1 %vm148_vm0, %v263_v21 }
 0x226   : > { %v242_v59 = vpop.permute.xlu1 %241 }
 0x227   : > { %v247_v60 = vsel %vm187_vm1, %v242_v59, 0 }
 0x228   : > { %256 = vmatpush.bf16.msra.mxu3 %v247_v60 }
 0x22e   : > { %v358_v61 = vpop.permute.xlu1 %357 }
 0x22f   : > { %v363_v62 = vsel %vm187_vm1, %v358_v61, 0 }
 0x230   : > { %372 = vmatpush.bf16.msrb.mxu2 %v363_v62 }
 0x28f   : > { %v587_v42 = vpop.f32.mrf.mxu1 }
 0x297   : > { %v202_v43 = vpop.f32.mrf.mxu1 }
 0x29f   : > { %v281_v47 = vpop.f32.mrf.mxu1 }
 0x2a0   : > { %v285_v49 = vmul.f32 0.35355338, %v281_v47 }
 0x2a2   : > { %v286_v50 = vadd.f32 %v285_v49, %v142_v10 }
 0x2a4   : > { %v287_v52 = vsel %vm148_vm0, %v286_v50, -inf }
 0x2a5   : > { %288 = vmax.xlane.f32.xlu0 %v287_v52 }
 0x2a7   : > { %v283_v54 = vpop.f32.mrf.mxu1 }
 0x2ad   : > { %236 = vadd.xlane.f32.xlu0 %v235_v56 }
 0x2b5   : > { %352 = vadd.xlane.f32.xlu0 %v351_v58 }
 0x318   : > { %v289_v63 = vpop.xlane.xlu0 %288 }
 0x319   : > { %v290_v0 = vsub.f32 %v286_v50, %v289_v63 }
 0x31b   : > { %v291_v1 = vmul.f32 1.442695, %v290_v0 }
 0x31d   : > { %497 = vpow2.f32 %v291_v1 }
 0x320   : > { %v237_v2 = vpop.xlane.xlu0 %236 }
 0x321   : > { %499 = vrcp.f32 %v237_v2 }
 0x323   : > { %v498_v4 = vpop.eup %497 }
 0x324   : > { %v293_v5 = vsel %vm148_vm0, %v498_v4, 0.0 }
 0x325   : > { %294 = vadd.xlane.f32.xlu0 %v293_v5 }
 0x327   : > { %v500_v6 = vpop.eup %499 }
 0x328   : > { %v353_v7 = vpop.xlane.xlu0 %352  ;;  %v239_v8 = vmul.f32 %v500_v6, %v494_v55 }
 0x329   : > { %501 = vrcp.f32 %v353_v7 }
 0x32a   : > { %v240_v9 = vpack.c.bf16 %v239_v8, %v239_v8 }
 0x32c   : > { %460 = vmatmul.msk.bf16.vlgmr.msra.gmra.mxu3 %vm148_vm0, %v240_v9 }
 0x32f   : > { %v502_v10 = vpop.eup %501 }
 0x330   : > { %v355_v11 = vmul.f32 %v502_v10, %v496_v57 }
 0x332   : > { %v356_v12 = vpack.c.bf16 %v355_v11, %v355_v11 }
 0x334   : > { %464 = vmatmul.msk.bf16.vlgmr.msrb.gmra.mxu2 %vm148_vm0, %v356_v12 }
 0x339   : > { %299 = vrot.lane.b32.xlu0 %v558_v3, %s523_s27 }
 0x398   : > { %v295_v13 = vpop.xlane.xlu0 %294 }
 0x399   : > { %503 = vrcp.f32 %v295_v13 }
 0x39f   : > { %v504_v14 = vpop.eup %503 }
 0x3a0   : > { %v297_v15 = vmul.f32 %v504_v14, %v498_v4 }
 0x3a2   : > { %v298_v18 = vpack.c.bf16 %v297_v15, %v297_v15 }
 0x3ab   : > { %v300_v16 = vpop.permute.xlu0 %299 }
 0x3ac   : > { %v305_v17 = vsel %vm187_vm1, %v300_v16, 0 }
 0x3ad   : > { %314 = vmatpush.bf16.msrb.mxu3 %v305_v17 }
 0x3af   : > { %v258_v19 = vpop.f32.mrf.mxu3 }
 0x3b0   : > { %462 = vmatmul.msk.bf16.vlgmr.msrb.gmra.mxu3 %vm148_vm0, %v298_v18  ;;  %379 = vrot.lane.b32.xlu2 %v258_v19, %s524_s28 }
 0x3b7   : > { %v260_v20 = vpop.f32.mrf.mxu3  ;;  %v374_v21 = vpop.f32.mrf.mxu2 }
 0x3bf   : > { %v376_v22 = vpop.f32.mrf.mxu2 }
 0x40a   : > { %v380_v25 = vpop.permute.xlu2 %379 }
 0x40b   : > { %v390_v26 = vsel %vm148_vm0, %v587_v42, %v380_v25 }
 0x433   : > { %v316_v23 = vpop.f32.mrf.mxu3 }
 0x434   : > { %383 = vrot.lane.b32.xlu1 %v316_v23, %s525_s29 }
 0x43b   : > { %v318_v3 = vpop.f32.mrf.mxu3 }
 0x43c   : > { %387 = vrot.lane.b32.xlu1 %v374_v21, %s526_s30 }
 0x4a6   : > { %v384_v24 = vpop.permute.xlu1 %383 }
 0x4a7   : > { %v392_v27 = vsel %vm391_vm2, %v390_v26, %v384_v24 }
 0x4ae   : > { %v388_v28 = vpop.permute.xlu1 %387 }
 0x4af   : > { %v394_v29 = vsel %vm393_vm3, %v392_v27, %v388_v28 }
 0x4b0   : > { %396 = vst.msk [vmem:[%s138_s5] sm:$0xff] %vm395_vm4, %v394_v29 }
 0x4b1 PF: > { %s12_s9 = sadd.s32 1, %s511_s9  }
 0x4b2   : > { %p9_p4 = scmp.ge.s32.totalorder %s12_s9, 4  }
 0x4b4   :  { %11 = sbr.rel (!%p9_p4) target bundleno = 1 (0x1), region = 58 }

// kernel: clip_text_encoder.17
= control target key start
LH: loop header
LB: loop body
LE: loop exit
PB: predicated region body
PF: predicated region fallthrough
CT: control target
= control target key end

     0   :  { %vm16_vm0 = vcmask 261120   ;;  %v95_v4 = vmov 32.0   ;;  %s140_s0 = inlined_call_operand.vmem [shape: f32[16,32], index: 0, kind: input, shape index: {}]   ;;  %s141_s1 = inlined_call_operand.vmem [shape: f32[1,32], index: 1, kind: input, shape index: {}]   ;;  %s142_s2 = inlined_call_operand.vmem [shape: f32[1,32], index: 2, kind: input, shape index: {}]   ;;  %s143_s3 = inlined_call_operand.vmem [shape: f32[16,32], index: 3, kind: output, shape index: {}]  }
   0x1   :  { %v14_v0 = vld [vmem:[%s140_s0] sm:$0xff]  ;;  %v15_v2 = vld [vmem:[%s140_s0 + $0x8] sm:$0xff]  ;;  %89 = vrcp.f32 %v95_v4 }
   0x2   :  { %v17_v1 = vsel %vm16_vm0, %v14_v0, 0.0  ;;  %v20_v3 = vsel %vm16_vm0, %v15_v2, 0.0  ;;  %v87_v35 = vld [vmem:[%s141_s1] ss:$0 sm:$0xff] }
   0x3   :  { %18 = vadd.xlane.f32.xlu0 %v17_v1  ;;  %v88_v38 = vld [vmem:[%s142_s2] ss:$0 sm:$0xff] }
   0x7   :  { %v90_v5 = vpop.eup %89 }
   0x8   :  { %v24_v6 = vmul.f32 32.0, %v90_v5  ;;  %vm28_vm1 = vweird.f32 %v90_v5 }
   0xa   :  { %v25_v7 = vsub.f32 1.0, %v24_v6 }
   0xb   :  { %21 = vadd.xlane.f32.xlu0 %v20_v3 }
   0xc   :  { %v26_v8 = vmul.f32 %v90_v5, %v25_v7 }
   0xe   :  { %v27_v9 = vadd.f32 %v90_v5, %v26_v8 }
  0x10   :  { %v29_v10 = vsel %vm28_vm1, %v90_v5, %v27_v9 }
  0x76   :  { %v19_v11 = vpop.xlane.xlu0 %18 }
  0x77   :  { %v30_v12 = vmul.f32 %v29_v10, %v19_v11 }
  0x79   :  { %v32_v13 = vsub.f32 %v14_v0, %v30_v12 }
  0x7b   :  { %v34_v14 = vmul.f32 %v32_v13, %v32_v13 }
  0x7d   :  { %v36_v15 = vsel %vm16_vm0, %v34_v14, 0.0 }
  0x7e   :  { %37 = vadd.xlane.f32.xlu1 %v36_v15  ;;  %v22_v16 = vpop.xlane.xlu0 %21 }
  0x7f   :  { %v31_v17 = vmul.f32 %v29_v10, %v22_v16 }
  0x81   :  { %v33_v18 = vsub.f32 %v15_v2, %v31_v17 }
  0x83   :  { %v35_v19 = vmul.f32 %v33_v18, %v33_v18 }
  0x85   :  { %v39_v20 = vsel %vm16_vm0, %v35_v19, 0.0 }
  0x86   :  { %40 = vadd.xlane.f32.xlu1 %v39_v20 }
  0xf1   :  { %v38_v21 = vpop.xlane.xlu1 %37 }
  0xf2   :  { %v42_v22 = vmul.f32 %v38_v21, %v29_v10 }
  0xf4   :  { %v44_v23 = vadd.f32 1e-05, %v42_v22 }
  0xf6   :  { %91 = vrsqrt.f32 %v44_v23  ;;  %vm52_vm3 = vweird.f32 %v44_v23 }
  0xf9   :  { %v41_v24 = vpop.xlane.xlu1 %40 }
  0xfa   :  { %v43_v25 = vmul.f32 %v41_v24, %v29_v10 }
  0xfc   :  { %v92_v26 = vpop.eup %91  ;;  %v45_v27 = vadd.f32 1e-05, %v43_v25 }
  0xfd   :  { %v47_v28 = vmul.f32 %v92_v26, %v44_v23  ;;  %vm53_vm2 = vweird.f32 %v92_v26 }
  0xfe   :  { %93 = vrsqrt.f32 %v45_v27  ;;  %vm54_vm4 = vmor %vm52_vm3, %vm53_vm2  ;;  %vm62_vm6 = vweird.f32 %v45_v27 }
  0xff   :  { %v48_v29 = vmul.f32 %v92_v26, %v47_v28 }
 0x101   :  { %v49_v30 = vmul.f32 0.5, %v48_v29 }
 0x103   :  { %v50_v31 = vsub.f32 1.5, %v49_v30 }
 0x104   :  { %v94_v32 = vpop.eup %93 }
 0x105   :  { %v51_v33 = vmul.f32 %v92_v26, %v50_v31  ;;  %v57_v34 = vmul.f32 %v94_v32, %v45_v27  ;;  %vm63_vm5 = vweird.f32 %v94_v32 }
 0x106   :  { %vm64_vm7 = vmor %vm62_vm6, %vm63_vm5 }
 0x107   :  { %v55_v36 = vsel %vm54_vm4, %v92_v26, %v51_v33  ;;  %v58_v37 = vmul.f32 %v94_v32, %v57_v34 }
 0x108   :  { %v66_v39 = vmul.f32 %v55_v36, %v32_v13 }
 0x109   :  { %v59_v40 = vmul.f32 0.5, %v58_v37 }
 0x10a   :  { %v72_v41 = vmul.f32 %v87_v35, %v66_v39 }
 0x10b   :  { %v60_v42 = vsub.f32 1.5, %v59_v40 }
 0x10c   :  { %v78_v43 = vadd.f32 %v88_v38, %v72_v41 }
 0x10d   :  { %v61_v44 = vmul.f32 %v94_v32, %v60_v42 }
 0x10e   :  { %80 = vst.msk [vmem:[%s143_s3] sm:$0xff] %vm16_vm0, %v78_v43 }
 0x10f   :  { %v65_v45 = vsel %vm64_vm7, %v94_v32, %v61_v44 }
 0x110   :  { %v67_v46 = vmul.f32 %v65_v45, %v33_v18 }
 0x112   :  { %v73_v47 = vmul.f32 %v87_v35, %v67_v46 }
 0x114   :  { %v79_v48 = vadd.f32 %v88_v38, %v73_v47 }
 0x116   :  { %81 = vst.msk [vmem:[%s143_s3 + $0x8] sm:$0xff] %vm16_vm0, %v79_v48 }

</bundles_post_ra>
